<compile_context>
chip_gen: v7x
topology: tpu7x:2x2x1
jax: 0.10.0
libtpu: 0.0.40
codegen_flags: <defaults>
</compile_context>

<pallas_src>
import functools

import jax
import jax.numpy as jnp
from jax.experimental import pallas as pl
from jax.experimental.pallas import tpu as pltpu


def mbconv_kernel(x_ref, cmask_ref, rmask_ref,
                  we_ref, b0_ref, wd_ref, b1_ref,
                  wsr_ref, bsr_ref, wse_ref, bse_ref, wp_ref, b2_ref,
                  o_ref, *, H, W, K, P, add_skip):
    HW = H * W
    L = P * HW                    # P images folded along the lane axis
    pad = (K - 1) // 2            # odd K, symmetric SAME padding
    hp = jax.lax.Precision.HIGHEST

    x = x_ref[...]                                   # (Cin, L), lane-dense
    cm = cmask_ref[...]                              # (K, L) 0/1 f32 column masks
    rm = rmask_ref[...]                              # (K, L) 0/1 f32 row masks

    # ---- expand 1x1 conv (BN0 scale folded) + bias + swish (MXU, HIGHEST) --
    y = jnp.dot(we_ref[...], x, preferred_element_type=jnp.float32,
                precision=hp)
    y = y + b0_ref[...]                              # (Coup,1) broadcast
    y = y * jax.nn.sigmoid(y)

    # ---- depthwise KxK conv, stride 1, SAME (BN1 scale folded) -------------
    # Spatial shifts are lane rotations (XLU) + precomputed 0/1 mask multiplies
    # on the flattened (folded) lane axis; per-tap weights are (Coup,1)
    # lane broadcasts.
    wd = wd_ref[...]                                 # (Coup, K*K), BN1-scaled
    y_shift = []
    for dx in range(K):
        off = dx - pad
        if off == 0:
            y_shift.append(y)
        else:
            r = pltpu.roll(y, (-off) % L, 1)         # r[:, i] = y[:, i + off]
            y_shift.append(r * cm[dx:dx + 1, :])
    acc = None
    for dy in range(K):
        u = y_shift[0] * wd[:, dy * K:dy * K + 1]
        for dx in range(1, K):
            u = u + y_shift[dx] * wd[:, dy * K + dx:dy * K + dx + 1]
        off = dy - pad
        if off != 0:
            u = pltpu.roll(u, (-off * W) % L, 1)     # shift by whole rows
            u = u * rm[dy:dy + 1, :]                 # masks image boundaries too
        acc = u if acc is None else acc + u
    z = acc + b1_ref[...]
    z = z * jax.nn.sigmoid(z)

    # ---- squeeze & excitation (per folded image; VPU/XLU only) -------------
    wsr = wsr_ref[...]                               # (Coup, Csq)
    wse = wse_ref[...]                               # (Coup, Csq)
    bsr = bsr_ref[...]                               # (1, Csq)
    bse = bse_ref[...]                               # (Coup, 1)
    inv_hw = jnp.float32(1.0 / HW)
    gated = []
    for n in range(P):                               # static, small P
        zn = z[:, n * HW:(n + 1) * HW]               # lane slice, 128-aligned
        pooled = jnp.sum(zn, axis=1, keepdims=True) * inv_hw         # (Coup,1)
        sq = jnp.sum(pooled * wsr, axis=0, keepdims=True) + bsr      # (1,Csq)
        sq = sq * jax.nn.sigmoid(sq)
        ex = bse + jnp.sum(wse * sq, axis=1, keepdims=True)          # (Coup,1)
        gated.append(zn * jax.nn.sigmoid(ex))
    zg = gated[0] if P == 1 else jnp.concatenate(gated, axis=1)

    # ---- project 1x1 conv (BN2 scale folded) + bias (MXU, HIGHEST) ---------
    p = jnp.dot(wp_ref[...], zg, preferred_element_type=jnp.float32,
                precision=hp)
    p = p + b2_ref[...]

    # ---- identity skip ------------------------------------------------------
    if add_skip:
        p = p + x

    o_ref[...] = p                                   # lane-dense (Cout, L) store


def mbconv_forward(x_nchw, params, *, eps, add_skip):
    """Wrapper: NCHW in / NCHW out; kernel runs on (C, images*H*W) lane tiles."""
    x = x_nchw.astype(jnp.float32)
    N, Cin, H, W = x.shape
    HW = H * W
    Coup, K, _ = params['wd'].shape
    Cout = params['wp'].shape[0]
    Csq = params['wsr'].shape[0]
    assert K % 2 == 1, "roll+mask depthwise only supports odd K (stride 1, SAME)"
    if add_skip:
        assert Cin == Cout, "id_skip requires input_filters == output_filters"

    # Grid: keep 2 'parallel' steps when N is even (v7x has 2 TensorCores);
    # fold the remaining batch into the lane axis of each step.
    G = 2 if (N % 2 == 0 and N >= 2) else 1
    P = N // G                     # images folded per grid step
    L = P * HW

    def fold_bn(g, b, m, v):
        s = g / jnp.sqrt(v + eps)
        return s, b - m * s

    s0, b0 = fold_bn(params['g0'], params['b0'], params['m0'], params['v0'])
    s1, b1 = fold_bn(params['g1'], params['b1'], params['m1'], params['v1'])
    s2, b2 = fold_bn(params['g2'], params['b2'], params['m2'], params['v2'])

    ops = [
        (params['we'] * s0[:, None]).astype(jnp.float32),            # (Coup, Cin)
        b0.reshape(Coup, 1).astype(jnp.float32),
        (params['wd'].reshape(Coup, K * K) * s1[:, None]).astype(jnp.float32),
        b1.reshape(Coup, 1).astype(jnp.float32),
        params['wsr'].T.astype(jnp.float32),                         # (Coup, Csq)
        params['bsr'].reshape(1, Csq).astype(jnp.float32),
        params['wse'].astype(jnp.float32),                           # (Coup, Csq)
        params['bse'].reshape(Coup, 1).astype(jnp.float32),
        (params['wp'] * s2[:, None]).astype(jnp.float32),            # (Cout, Coup)
        b2.reshape(Cout, 1).astype(jnp.float32),
    ]

    # Precompute the depthwise boundary masks once (no in-kernel iota/mod/div).
    # hrow uses % H so dy shifts never leak rows between folded images.
    pad = (K - 1) // 2
    lane = jnp.arange(L, dtype=jnp.int32)
    wcol = lane % W
    hrow = (lane // W) % H
    cmask_rows, rmask_rows = [], []
    for d in range(K):
        off = d - pad
        if off < 0:
            cmask_rows.append(wcol >= -off)
            rmask_rows.append(hrow >= -off)
        elif off > 0:
            cmask_rows.append(wcol < W - off)
            rmask_rows.append(hrow < H - off)
        else:
            cmask_rows.append(jnp.ones((L,), dtype=bool))
            rmask_rows.append(jnp.ones((L,), dtype=bool))
    cmask = jnp.stack(cmask_rows).astype(jnp.float32)                # (K, L)
    rmask = jnp.stack(rmask_rows).astype(jnp.float32)                # (K, L)

    # Fold the batch into the lane axis: (N, Cin, H, W) -> (Cin, N*HW).
    x_flat = jnp.transpose(x.reshape(N, Cin, HW), (1, 0, 2)).reshape(Cin, N * HW)

    kernel = functools.partial(mbconv_kernel, H=H, W=W, K=K, P=P,
                               add_skip=add_skip)

    in_specs = [pl.BlockSpec((Cin, L), lambda g: (0, g)),
                pl.BlockSpec((K, L), lambda g: (0, 0)),
                pl.BlockSpec((K, L), lambda g: (0, 0))]
    in_specs += [pl.BlockSpec(p.shape, lambda g: (0, 0)) for p in ops]

    out = pl.pallas_call(
        kernel,
        out_shape=jax.ShapeDtypeStruct((Cout, N * HW), jnp.float32),
        grid=(G,),
        in_specs=in_specs,
        out_specs=pl.BlockSpec((Cout, L), lambda g: (0, g)),
        compiler_params=pltpu.CompilerParams(dimension_semantics=("parallel",)),
    )(x_flat, cmask, rmask, *ops)

    return jnp.transpose(out.reshape(Cout, N, HW), (1, 0, 2)).reshape(N, Cout, H, W)


def reference_forward(x, p, eps):
    """Pure-JAX NCHW reference (mirrors the PyTorch forward, inference BN)."""
    hp = jax.lax.Precision.HIGHEST
    dn = ('NCHW', 'OIHW', 'NCHW')

    def bn(v, g, b, m, var):
        sh = (1, -1, 1, 1)
        return ((v - m.reshape(sh)) / jnp.sqrt(var.reshape(sh) + eps)
                * g.reshape(sh) + b.reshape(sh))

    def swish(v):
        return v * jax.nn.sigmoid(v)

    Coup = p['wd'].shape[0]
    y = jax.lax.conv_general_dilated(x, p['we'][:, :, None, None], (1, 1), 'SAME',
                                     dimension_numbers=dn, precision=hp)
    y = swish(bn(y, p['g0'], p['b0'], p['m0'], p['v0']))
    z = jax.lax.conv_general_dilated(y, p['wd'][:, None, :, :], (1, 1), 'SAME',
                                     dimension_numbers=dn, feature_group_count=Coup,
                                     precision=hp)
    z = swish(bn(z, p['g1'], p['b1'], p['m1'], p['v1']))
    s = jnp.mean(z, axis=(2, 3), keepdims=True)
    s = jax.lax.conv_general_dilated(s, p['wsr'][:, :, None, None], (1, 1), 'SAME',
                                     dimension_numbers=dn, precision=hp)
    s = swish(s + p['bsr'].reshape(1, -1, 1, 1))
    s = jax.lax.conv_general_dilated(s, p['wse'][:, :, None, None], (1, 1), 'SAME',
                                     dimension_numbers=dn, precision=hp)
    s = s + p['bse'].reshape(1, -1, 1, 1)
    z = jax.nn.sigmoid(s) * z
    o = jax.lax.conv_general_dilated(z, p['wp'][:, :, None, None], (1, 1), 'SAME',
                                     dimension_numbers=dn, precision=hp)
    o = bn(o, p['g2'], p['b2'], p['m2'], p['v2'])
    return o + x


if __name__ == "__main__":
    # Block configuration (small, consistent with MBConvBlock.__init__).
    # N=4 so the batch fold is actually exercised: grid=(2,) parallel steps,
    # 2 images folded per step.
    N, Cin, H, W = 4, 8, 16, 16
    expand_ratio, K, stride, se_ratio = 4, 3, 1, 0.25
    Coup = Cin * expand_ratio                      # 32
    Csq = max(1, int(Cin * se_ratio))              # 2
    Cout = Cin                                     # id_skip path active
    eps = 1e-3

    keys = jax.random.split(jax.random.PRNGKey(0), 20)

    def nrm(k, shape, scale=0.2):
        return scale * jax.random.normal(k, shape, jnp.float32)

    x = jax.random.normal(keys[0], (N, Cin, H, W), jnp.float32)

    # Parameters in PyTorch convention (OIHW squeezed / 1-D BN vectors).
    params = {
        'we': nrm(keys[1], (Coup, Cin)),                   # expand conv (O, I)
        'g0': 1.0 + nrm(keys[2], (Coup,), 0.1), 'b0': nrm(keys[3], (Coup,), 0.1),
        'm0': nrm(keys[4], (Coup,), 0.1),
        'v0': 0.5 + jnp.abs(nrm(keys[5], (Coup,), 0.2)),
        'wd': nrm(keys[6], (Coup, K, K)),                  # depthwise (O, kH, kW)
        'g1': 1.0 + nrm(keys[7], (Coup,), 0.1), 'b1': nrm(keys[8], (Coup,), 0.1),
        'm1': nrm(keys[9], (Coup,), 0.1),
        'v1': 0.5 + jnp.abs(nrm(keys[10], (Coup,), 0.2)),
        'wsr': nrm(keys[11], (Csq, Coup)),                 # se_reduce (O, I)
        'bsr': nrm(keys[12], (Csq,), 0.1),
        'wse': nrm(keys[13], (Coup, Csq)),                 # se_expand (O, I)
        'bse': nrm(keys[14], (Coup,), 0.1),
        'wp': nrm(keys[15], (Cout, Coup)),                 # project conv (O, I)
        'g2': 1.0 + nrm(keys[16], (Cout,), 0.1), 'b2': nrm(keys[17], (Cout,), 0.1),
        'm2': nrm(keys[18], (Cout,), 0.1),
        'v2': 0.5 + jnp.abs(nrm(keys[19], (Cout,), 0.2)),
    }

    out = mbconv_forward(x, params, eps=eps, add_skip=True)
    out = jax.block_until_ready(out)
    assert out.shape == (N, Cout, H, W), out.shape

    ref = reference_forward(x, params, eps)
    max_err = float(jnp.max(jnp.abs(out - ref)))
    # HIGHEST-precision matmuls restored -> tight agreement with the f32
    # HIGHEST XLA reference.
    if not jnp.allclose(out, ref, atol=2e-4, rtol=2e-4):
        raise AssertionError(f"Pallas kernel mismatch vs reference, max abs err={max_err}")

    print("KERNEL_OK")
</pallas_src>

<mosaic_0001>
module attributes {stable_mosaic.version = 11 : i64} {
  func.func @mbconv_kernel(%arg0: i32, %arg1: memref<8x512xf32, #tpu.memory_space<vmem>>, %arg2: memref<3x512xf32, #tpu.memory_space<vmem>>, %arg3: memref<3x512xf32, #tpu.memory_space<vmem>>, %arg4: memref<32x8xf32, #tpu.memory_space<vmem>>, %arg5: memref<32x1xf32, #tpu.memory_space<vmem>>, %arg6: memref<32x9xf32, #tpu.memory_space<vmem>>, %arg7: memref<32x1xf32, #tpu.memory_space<vmem>>, %arg8: memref<32x2xf32, #tpu.memory_space<vmem>>, %arg9: memref<1x2xf32, #tpu.memory_space<vmem>>, %arg10: memref<32x2xf32, #tpu.memory_space<vmem>>, %arg11: memref<32x1xf32, #tpu.memory_space<vmem>>, %arg12: memref<8x32xf32, #tpu.memory_space<vmem>>, %arg13: memref<8x1xf32, #tpu.memory_space<vmem>>, %arg14: memref<8x512xf32, #tpu.memory_space<vmem>>) attributes {dimension_semantics = [#tpu.dimension_semantics<parallel>], iteration_bounds = array<i64: 2>, scalar_prefetch = 0 : i64, scratch_operands = 0 : i64, tpu.core_type = #tpu.core_type<tc>, window_params = [{transform_indices = @transform_0, window_bounds = array<i64: 8, 512>}, {pipeline_mode = #tpu.pipeline_mode<synchronous>, transform_indices = @transform_1, window_bounds = array<i64: 3, 512>}, {pipeline_mode = #tpu.pipeline_mode<synchronous>, transform_indices = @transform_2, window_bounds = array<i64: 3, 512>}, {pipeline_mode = #tpu.pipeline_mode<synchronous>, transform_indices = @transform_3, window_bounds = array<i64: 32, 8>}, {pipeline_mode = #tpu.pipeline_mode<synchronous>, transform_indices = @transform_4, window_bounds = array<i64: 32, 1>}, {pipeline_mode = #tpu.pipeline_mode<synchronous>, transform_indices = @transform_5, window_bounds = array<i64: 32, 9>}, {pipeline_mode = #tpu.pipeline_mode<synchronous>, transform_indices = @transform_6, window_bounds = array<i64: 32, 1>}, {pipeline_mode = #tpu.pipeline_mode<synchronous>, transform_indices = @transform_7, window_bounds = array<i64: 32, 2>}, {pipeline_mode = #tpu.pipeline_mode<synchronous>, transform_indices = @transform_8, window_bounds = array<i64: 1, 2>}, {pipeline_mode = #tpu.pipeline_mode<synchronous>, transform_indices = @transform_9, window_bounds = array<i64: 32, 2>}, {pipeline_mode = #tpu.pipeline_mode<synchronous>, transform_indices = @transform_10, window_bounds = array<i64: 32, 1>}, {pipeline_mode = #tpu.pipeline_mode<synchronous>, transform_indices = @transform_11, window_bounds = array<i64: 8, 32>}, {pipeline_mode = #tpu.pipeline_mode<synchronous>, transform_indices = @transform_12, window_bounds = array<i64: 8, 1>}, {transform_indices = @transform_13, window_bounds = array<i64: 8, 512>}]} {
    %c0 = arith.constant 0 : index
    %c0_0 = arith.constant 0 : index
    %0 = vector.load %arg1[%c0, %c0_0] : memref<8x512xf32, #tpu.memory_space<vmem>>, vector<8x512xf32>
    %c0_1 = arith.constant 0 : index
    %c0_2 = arith.constant 0 : index
    %1 = vector.load %arg2[%c0_1, %c0_2] : memref<3x512xf32, #tpu.memory_space<vmem>>, vector<3x512xf32>
    %c0_3 = arith.constant 0 : index
    %c0_4 = arith.constant 0 : index
    %2 = vector.load %arg3[%c0_3, %c0_4] : memref<3x512xf32, #tpu.memory_space<vmem>>, vector<3x512xf32>
    %c0_5 = arith.constant 0 : index
    %c0_6 = arith.constant 0 : index
    %3 = vector.load %arg4[%c0_5, %c0_6] : memref<32x8xf32, #tpu.memory_space<vmem>>, vector<32x8xf32>
    %cst = arith.constant dense<0.000000e+00> : vector<32x512xf32>
    %4 = tpu.matmul %3, %0, %cst {dimension_numbers = #tpu.dot_dimension_numbers<[1], [0], [0], [1], [0, 0, 1, 1], [], []>, precision = #tpu.contract_precision<fp32>} : vector<32x8xf32>, vector<8x512xf32>, vector<32x512xf32> -> vector<32x512xf32>
    %c0_7 = arith.constant 0 : index
    %c0_8 = arith.constant 0 : index
    %5 = vector.load %arg5[%c0_7, %c0_8] : memref<32x1xf32, #tpu.memory_space<vmem>>, vector<32x1xf32>
    %6 = vector.broadcast %5 : vector<32x1xf32> to vector<32x512xf32>
    %7 = arith.addf %4, %6 : vector<32x512xf32>
    %8 = arith.negf %7 : vector<32x512xf32>
    %9 = math.exp %8 : vector<32x512xf32>
    %cst_9 = arith.constant 1.000000e+00 : f32
    %10 = vector.broadcast %cst_9 : f32 to vector<32x512xf32>
    %11 = arith.addf %10, %9 : vector<32x512xf32>
    %12 = arith.divf %10, %11 : vector<32x512xf32>
    %13 = arith.mulf %7, %12 : vector<32x512xf32>
    %c0_10 = arith.constant 0 : index
    %c0_11 = arith.constant 0 : index
    %14 = vector.load %arg6[%c0_10, %c0_11] : memref<32x9xf32, #tpu.memory_space<vmem>>, vector<32x9xf32>
    %c1_i32 = arith.constant 1 : i32
    %15 = tpu.dynamic_rotate %13 by %c1_i32 dim 1 : vector<32x512xf32>, i32 -> vector<32x512xf32>
    %16 = vector.extract_strided_slice %1 {offsets = [0, 0], sizes = [1, 512], strides = [1, 1]} : vector<3x512xf32> to vector<1x512xf32>
    %17 = vector.broadcast %16 : vector<1x512xf32> to vector<32x512xf32>
    %18 = arith.mulf %15, %17 : vector<32x512xf32>
    %c511_i32 = arith.constant 511 : i32
    %19 = tpu.dynamic_rotate %13 by %c511_i32 dim 1 : vector<32x512xf32>, i32 -> vector<32x512xf32>
    %20 = vector.extract_strided_slice %1 {offsets = [2, 0], sizes = [1, 512], strides = [1, 1]} : vector<3x512xf32> to vector<1x512xf32>
    %21 = vector.broadcast %20 : vector<1x512xf32> to vector<32x512xf32>
    %22 = arith.mulf %19, %21 : vector<32x512xf32>
    %23 = vector.extract_strided_slice %14 {offsets = [0, 0], sizes = [32, 1], strides = [1, 1]} : vector<32x9xf32> to vector<32x1xf32>
    %24 = vector.broadcast %23 : vector<32x1xf32> to vector<32x512xf32>
    %25 = arith.mulf %18, %24 : vector<32x512xf32>
    %26 = vector.extract_strided_slice %14 {offsets = [0, 1], sizes = [32, 1], strides = [1, 1]} : vector<32x9xf32> to vector<32x1xf32>
    %27 = vector.broadcast %26 : vector<32x1xf32> to vector<32x512xf32>
    %28 = arith.mulf %13, %27 : vector<32x512xf32>
    %29 = arith.addf %25, %28 : vector<32x512xf32>
    %30 = vector.extract_strided_slice %14 {offsets = [0, 2], sizes = [32, 1], strides = [1, 1]} : vector<32x9xf32> to vector<32x1xf32>
    %31 = vector.broadcast %30 : vector<32x1xf32> to vector<32x512xf32>
    %32 = arith.mulf %22, %31 : vector<32x512xf32>
    %33 = arith.addf %29, %32 : vector<32x512xf32>
    %c16_i32 = arith.constant 16 : i32
    %34 = tpu.dynamic_rotate %33 by %c16_i32 dim 1 : vector<32x512xf32>, i32 -> vector<32x512xf32>
    %35 = vector.extract_strided_slice %2 {offsets = [0, 0], sizes = [1, 512], strides = [1, 1]} : vector<3x512xf32> to vector<1x512xf32>
    %36 = vector.broadcast %35 : vector<1x512xf32> to vector<32x512xf32>
    %37 = arith.mulf %34, %36 : vector<32x512xf32>
    %38 = vector.extract_strided_slice %14 {offsets = [0, 3], sizes = [32, 1], strides = [1, 1]} : vector<32x9xf32> to vector<32x1xf32>
    %39 = vector.broadcast %38 : vector<32x1xf32> to vector<32x512xf32>
    %40 = arith.mulf %18, %39 : vector<32x512xf32>
    %41 = vector.extract_strided_slice %14 {offsets = [0, 4], sizes = [32, 1], strides = [1, 1]} : vector<32x9xf32> to vector<32x1xf32>
    %42 = vector.broadcast %41 : vector<32x1xf32> to vector<32x512xf32>
    %43 = arith.mulf %13, %42 : vector<32x512xf32>
    %44 = arith.addf %40, %43 : vector<32x512xf32>
    %45 = vector.extract_strided_slice %14 {offsets = [0, 5], sizes = [32, 1], strides = [1, 1]} : vector<32x9xf32> to vector<32x1xf32>
    %46 = vector.broadcast %45 : vector<32x1xf32> to vector<32x512xf32>
    %47 = arith.mulf %22, %46 : vector<32x512xf32>
    %48 = arith.addf %44, %47 : vector<32x512xf32>
    %49 = arith.addf %37, %48 : vector<32x512xf32>
    %50 = vector.extract_strided_slice %14 {offsets = [0, 6], sizes = [32, 1], strides = [1, 1]} : vector<32x9xf32> to vector<32x1xf32>
    %51 = vector.broadcast %50 : vector<32x1xf32> to vector<32x512xf32>
    %52 = arith.mulf %18, %51 : vector<32x512xf32>
    %53 = vector.extract_strided_slice %14 {offsets = [0, 7], sizes = [32, 1], strides = [1, 1]} : vector<32x9xf32> to vector<32x1xf32>
    %54 = vector.broadcast %53 : vector<32x1xf32> to vector<32x512xf32>
    %55 = arith.mulf %13, %54 : vector<32x512xf32>
    %56 = arith.addf %52, %55 : vector<32x512xf32>
    %57 = vector.extract_strided_slice %14 {offsets = [0, 8], sizes = [32, 1], strides = [1, 1]} : vector<32x9xf32> to vector<32x1xf32>
    %58 = vector.broadcast %57 : vector<32x1xf32> to vector<32x512xf32>
    %59 = arith.mulf %22, %58 : vector<32x512xf32>
    %60 = arith.addf %56, %59 : vector<32x512xf32>
    %c496_i32 = arith.constant 496 : i32
    %61 = tpu.dynamic_rotate %60 by %c496_i32 dim 1 : vector<32x512xf32>, i32 -> vector<32x512xf32>
    %62 = vector.extract_strided_slice %2 {offsets = [2, 0], sizes = [1, 512], strides = [1, 1]} : vector<3x512xf32> to vector<1x512xf32>
    %63 = vector.broadcast %62 : vector<1x512xf32> to vector<32x512xf32>
    %64 = arith.mulf %61, %63 : vector<32x512xf32>
    %65 = arith.addf %49, %64 : vector<32x512xf32>
    %c0_12 = arith.constant 0 : index
    %c0_13 = arith.constant 0 : index
    %66 = vector.load %arg7[%c0_12, %c0_13] : memref<32x1xf32, #tpu.memory_space<vmem>>, vector<32x1xf32>
    %67 = vector.broadcast %66 : vector<32x1xf32> to vector<32x512xf32>
    %68 = arith.addf %65, %67 : vector<32x512xf32>
    %69 = arith.negf %68 : vector<32x512xf32>
    %70 = math.exp %69 : vector<32x512xf32>
    %cst_14 = arith.constant 1.000000e+00 : f32
    %71 = vector.broadcast %cst_14 : f32 to vector<32x512xf32>
    %72 = arith.addf %71, %70 : vector<32x512xf32>
    %73 = arith.divf %71, %72 : vector<32x512xf32>
    %74 = arith.mulf %68, %73 : vector<32x512xf32>
    %c0_15 = arith.constant 0 : index
    %c0_16 = arith.constant 0 : index
    %75 = vector.load %arg8[%c0_15, %c0_16] : memref<32x2xf32, #tpu.memory_space<vmem>>, vector<32x2xf32>
    %c0_17 = arith.constant 0 : index
    %c0_18 = arith.constant 0 : index
    %76 = vector.load %arg10[%c0_17, %c0_18] : memref<32x2xf32, #tpu.memory_space<vmem>>, vector<32x2xf32>
    %c0_19 = arith.constant 0 : index
    %c0_20 = arith.constant 0 : index
    %77 = vector.load %arg9[%c0_19, %c0_20] : memref<1x2xf32, #tpu.memory_space<vmem>>, vector<1x2xf32>
    %c0_21 = arith.constant 0 : index
    %c0_22 = arith.constant 0 : index
    %78 = vector.load %arg11[%c0_21, %c0_22] : memref<32x1xf32, #tpu.memory_space<vmem>>, vector<32x1xf32>
    %79 = vector.extract_strided_slice %74 {offsets = [0, 0], sizes = [32, 256], strides = [1, 1]} : vector<32x512xf32> to vector<32x256xf32>
    %cst_23 = arith.constant dense<0.000000e+00> : vector<32xf32>
    %80 = vector.multi_reduction <add>, %79, %cst_23 [1] : vector<32x256xf32> to vector<32xf32>
    %81 = vector.shape_cast %80 : vector<32xf32> to vector<32x1xf32>
    %cst_24 = arith.constant 3.906250e-03 : f32
    %82 = vector.broadcast %cst_24 : f32 to vector<32x1xf32>
    %83 = arith.mulf %81, %82 : vector<32x1xf32>
    %84 = vector.broadcast %83 : vector<32x1xf32> to vector<32x2xf32>
    %85 = arith.mulf %84, %75 : vector<32x2xf32>
    %cst_25 = arith.constant dense<0.000000e+00> : vector<2xf32>
    %86 = vector.multi_reduction <add>, %85, %cst_25 [0] : vector<32x2xf32> to vector<2xf32>
    %87 = vector.shape_cast %86 : vector<2xf32> to vector<1x2xf32>
    %88 = arith.addf %87, %77 : vector<1x2xf32>
    %89 = arith.negf %88 : vector<1x2xf32>
    %90 = math.exp %89 : vector<1x2xf32>
    %cst_26 = arith.constant 1.000000e+00 : f32
    %91 = vector.broadcast %cst_26 : f32 to vector<1x2xf32>
    %92 = arith.addf %91, %90 : vector<1x2xf32>
    %93 = arith.divf %91, %92 : vector<1x2xf32>
    %94 = arith.mulf %88, %93 : vector<1x2xf32>
    %95 = vector.broadcast %94 : vector<1x2xf32> to vector<32x2xf32>
    %96 = arith.mulf %76, %95 : vector<32x2xf32>
    %cst_27 = arith.constant dense<0.000000e+00> : vector<32xf32>
    %97 = vector.multi_reduction <add>, %96, %cst_27 [1] : vector<32x2xf32> to vector<32xf32>
    %98 = vector.shape_cast %97 : vector<32xf32> to vector<32x1xf32>
    %99 = arith.addf %78, %98 : vector<32x1xf32>
    %100 = arith.negf %99 : vector<32x1xf32>
    %101 = math.exp %100 : vector<32x1xf32>
    %cst_28 = arith.constant 1.000000e+00 : f32
    %102 = vector.broadcast %cst_28 : f32 to vector<32x1xf32>
    %103 = arith.addf %102, %101 : vector<32x1xf32>
    %104 = arith.divf %102, %103 : vector<32x1xf32>
    %105 = vector.broadcast %104 : vector<32x1xf32> to vector<32x256xf32>
    %106 = arith.mulf %79, %105 : vector<32x256xf32>
    %107 = vector.extract_strided_slice %74 {offsets = [0, 256], sizes = [32, 256], strides = [1, 1]} : vector<32x512xf32> to vector<32x256xf32>
    %cst_29 = arith.constant dense<0.000000e+00> : vector<32xf32>
    %108 = vector.multi_reduction <add>, %107, %cst_29 [1] : vector<32x256xf32> to vector<32xf32>
    %109 = vector.shape_cast %108 : vector<32xf32> to vector<32x1xf32>
    %cst_30 = arith.constant 3.906250e-03 : f32
    %110 = vector.broadcast %cst_30 : f32 to vector<32x1xf32>
    %111 = arith.mulf %109, %110 : vector<32x1xf32>
    %112 = vector.broadcast %111 : vector<32x1xf32> to vector<32x2xf32>
    %113 = arith.mulf %112, %75 : vector<32x2xf32>
    %cst_31 = arith.constant dense<0.000000e+00> : vector<2xf32>
    %114 = vector.multi_reduction <add>, %113, %cst_31 [0] : vector<32x2xf32> to vector<2xf32>
    %115 = vector.shape_cast %114 : vector<2xf32> to vector<1x2xf32>
    %116 = arith.addf %115, %77 : vector<1x2xf32>
    %117 = arith.negf %116 : vector<1x2xf32>
    %118 = math.exp %117 : vector<1x2xf32>
    %cst_32 = arith.constant 1.000000e+00 : f32
    %119 = vector.broadcast %cst_32 : f32 to vector<1x2xf32>
    %120 = arith.addf %119, %118 : vector<1x2xf32>
    %121 = arith.divf %119, %120 : vector<1x2xf32>
    %122 = arith.mulf %116, %121 : vector<1x2xf32>
    %123 = vector.broadcast %122 : vector<1x2xf32> to vector<32x2xf32>
    %124 = arith.mulf %76, %123 : vector<32x2xf32>
    %cst_33 = arith.constant dense<0.000000e+00> : vector<32xf32>
    %125 = vector.multi_reduction <add>, %124, %cst_33 [1] : vector<32x2xf32> to vector<32xf32>
    %126 = vector.shape_cast %125 : vector<32xf32> to vector<32x1xf32>
    %127 = arith.addf %78, %126 : vector<32x1xf32>
    %128 = arith.negf %127 : vector<32x1xf32>
    %129 = math.exp %128 : vector<32x1xf32>
    %cst_34 = arith.constant 1.000000e+00 : f32
    %130 = vector.broadcast %cst_34 : f32 to vector<32x1xf32>
    %131 = arith.addf %130, %129 : vector<32x1xf32>
    %132 = arith.divf %130, %131 : vector<32x1xf32>
    %133 = vector.broadcast %132 : vector<32x1xf32> to vector<32x256xf32>
    %134 = arith.mulf %107, %133 : vector<32x256xf32>
    %135 = tpu.concatenate %106, %134 in 1 : vector<32x256xf32>, vector<32x256xf32> -> vector<32x512xf32>
    %c0_35 = arith.constant 0 : index
    %c0_36 = arith.constant 0 : index
    %136 = vector.load %arg12[%c0_35, %c0_36] : memref<8x32xf32, #tpu.memory_space<vmem>>, vector<8x32xf32>
    %cst_37 = arith.constant dense<0.000000e+00> : vector<8x512xf32>
    %137 = tpu.matmul %136, %135, %cst_37 {dimension_numbers = #tpu.dot_dimension_numbers<[1], [0], [0], [1], [0, 0, 1, 1], [], []>, precision = #tpu.contract_precision<fp32>} : vector<8x32xf32>, vector<32x512xf32>, vector<8x512xf32> -> vector<8x512xf32>
    %c0_38 = arith.constant 0 : index
    %c0_39 = arith.constant 0 : index
    %138 = vector.load %arg13[%c0_38, %c0_39] : memref<8x1xf32, #tpu.memory_space<vmem>>, vector<8x1xf32>
    %139 = vector.broadcast %138 : vector<8x1xf32> to vector<8x512xf32>
    %140 = arith.addf %137, %139 : vector<8x512xf32>
    %141 = arith.addf %140, %0 : vector<8x512xf32>
    %c0_40 = arith.constant 0 : index
    %c0_41 = arith.constant 0 : index
    %142 = vector.load %arg14[%c0_40, %c0_41] : memref<8x512xf32, #tpu.memory_space<vmem>>, vector<8x512xf32>
    tpu.vector_store %arg14[%c0_40, %c0_41], %141 {strides = array<i32>} : memref<8x512xf32, #tpu.memory_space<vmem>>, vector<8x512xf32>,
    return
  }
  func.func @transform_0(%arg0: i32) -> (i32, i32) {
    %c0_i32 = arith.constant 0 : i32
    %c0_i32_0 = arith.constant 0 : i32
    return %c0_i32, %arg0 : i32, i32
  }
  func.func @transform_1(%arg0: i32) -> (i32, i32) {
    %c0_i32 = arith.constant 0 : i32
    %c0_i32_0 = arith.constant 0 : i32
    %c0_i32_1 = arith.constant 0 : i32
    return %c0_i32, %c0_i32_0 : i32, i32
  }
  func.func @transform_2(%arg0: i32) -> (i32, i32) {
    %c0_i32 = arith.constant 0 : i32
    %c0_i32_0 = arith.constant 0 : i32
    %c0_i32_1 = arith.constant 0 : i32
    return %c0_i32, %c0_i32_0 : i32, i32
  }
  func.func @transform_3(%arg0: i32) -> (i32, i32) {
    %c0_i32 = arith.constant 0 : i32
    %c0_i32_0 = arith.constant 0 : i32
    %c0_i32_1 = arith.constant 0 : i32
    return %c0_i32, %c0_i32_0 : i32, i32
  }
  func.func @transform_4(%arg0: i32) -> (i32, i32) {
    %c0_i32 = arith.constant 0 : i32
    %c0_i32_0 = arith.constant 0 : i32
    %c0_i32_1 = arith.constant 0 : i32
    return %c0_i32, %c0_i32_0 : i32, i32
  }
  func.func @transform_5(%arg0: i32) -> (i32, i32) {
    %c0_i32 = arith.constant 0 : i32
    %c0_i32_0 = arith.constant 0 : i32
    %c0_i32_1 = arith.constant 0 : i32
    return %c0_i32, %c0_i32_0 : i32, i32
  }
  func.func @transform_6(%arg0: i32) -> (i32, i32) {
    %c0_i32 = arith.constant 0 : i32
    %c0_i32_0 = arith.constant 0 : i32
    %c0_i32_1 = arith.constant 0 : i32
    return %c0_i32, %c0_i32_0 : i32, i32
  }
  func.func @transform_7(%arg0: i32) -> (i32, i32) {
    %c0_i32 = arith.constant 0 : i32
    %c0_i32_0 = arith.constant 0 : i32
    %c0_i32_1 = arith.constant 0 : i32
    return %c0_i32, %c0_i32_0 : i32, i32
  }
  func.func @transform_8(%arg0: i32) -> (i32, i32) {
    %c0_i32 = arith.constant 0 : i32
    %c0_i32_0 = arith.constant 0 : i32
    %c0_i32_1 = arith.constant 0 : i32
    return %c0_i32, %c0_i32_0 : i32, i32
  }
  func.func @transform_9(%arg0: i32) -> (i32, i32) {
    %c0_i32 = arith.constant 0 : i32
    %c0_i32_0 = arith.constant 0 : i32
    %c0_i32_1 = arith.constant 0 : i32
    return %c0_i32, %c0_i32_0 : i32, i32
  }
  func.func @transform_10(%arg0: i32) -> (i32, i32) {
    %c0_i32 = arith.constant 0 : i32
    %c0_i32_0 = arith.constant 0 : i32
    %c0_i32_1 = arith.constant 0 : i32
    return %c0_i32, %c0_i32_0 : i32, i32
  }
  func.func @transform_11(%arg0: i32) -> (i32, i32) {
    %c0_i32 = arith.constant 0 : i32
    %c0_i32_0 = arith.constant 0 : i32
    %c0_i32_1 = arith.constant 0 : i32
    return %c0_i32, %c0_i32_0 : i32, i32
  }
  func.func @transform_12(%arg0: i32) -> (i32, i32) {
    %c0_i32 = arith.constant 0 : i32
    %c0_i32_0 = arith.constant 0 : i32
    %c0_i32_1 = arith.constant 0 : i32
    return %c0_i32, %c0_i32_0 : i32, i32
  }
  func.func @transform_13(%arg0: i32) -> (i32, i32) {
    %c0_i32 = arith.constant 0 : i32
    %c0_i32_0 = arith.constant 0 : i32
    return %c0_i32, %arg0 : i32, i32
  }
}

</mosaic_0001>

<bundles_post_ra>
// kernel: tpu_custom_call.1
= control target key start
LH: loop header
LB: loop body
LE: loop exit
PB: predicated region body
PF: predicated region fallthrough
CT: control target
= control target key end

     0   :  { %s6813_s0 = inlined_call_operand.vmem [shape: f32[8,1024], index: 0, kind: input, shape index: {}]   ;;  %s6814_s1 = inlined_call_operand.vmem [shape: f32[3,512], index: 1, kind: input, shape index: {}]   ;;  %s6815_s2 = inlined_call_operand.vmem [shape: f32[3,512], index: 2, kind: input, shape index: {}]   ;;  %s6816_s3 = inlined_call_operand.vmem [shape: f32[32,8], index: 3, kind: input, shape index: {}]   ;;  %s6817_s4 = inlined_call_operand.vmem [shape: f32[32,1], index: 4, kind: input, shape index: {}]   ;;  %s6818_s5 = inlined_call_operand.vmem [shape: f32[32,9], index: 5, kind: input, shape index: {}]   ;;  %s6819_s6 = inlined_call_operand.vmem [shape: f32[32,1], index: 6, kind: input, shape index: {}]   ;;  %s6820_s7 = inlined_call_operand.vmem [shape: f32[32,2], index: 7, kind: input, shape index: {}]   ;;  %s6821_s8 = inlined_call_operand.vmem [shape: f32[1,2], index: 8, kind: input, shape index: {}]   ;;  %s6822_s9 = inlined_call_operand.vmem [shape: f32[32,2], index: 9, kind: input, shape index: {}]   ;;  %s6823_s10 = inlined_call_operand.vmem [shape: f32[32,1], index: 10, kind: input, shape index: {}]   ;;  %s6824_s11 = inlined_call_operand.vmem [shape: f32[8,32], index: 11, kind: input, shape index: {}]   ;;  %s6825_s12 = inlined_call_operand.vmem [shape: f32[8,1], index: 12, kind: input, shape index: {}]   ;;  %s6826_s13 = inlined_call_operand.hbm [shape: f32[8,1024], index: 13, kind: output, shape index: {}]  }
   0x1   :  { %6858 = sst [smem:[#allocation58_spill]] %s6813_s0 }
   0x2   :  { %6859 = sst [smem:[#allocation59_spill]] %s6814_s1 }
   0x3   :  { %6860 = sst [smem:[#allocation60_spill]] %s6816_s3 }
   0x4   :  { %18 = vsyncpa [#allocation3], 0 }
   0x5   :  { %20 = vsyncpa [#allocation3 + $0x1], 0  ;;  %s4912_s25 = smov 0   ;;  %s4914_s26 = smov 0  }
   0x6   :  { %s4916_s27 = smov 0   ;;  %s4918_s28 = smov 0  }
   0x7 LB: > { %s4933_s29 = sadd.s32 4294967295, %s4825_s28   ;;  %s4240_s30 = sadd.s32 4294967294, %s4825_s28   ;;  %s4825_s28 = sphi %s4918_s28, %s6986_s28   ;;  %s4821_s27 = sphi %s4916_s27, %s6985_s27   ;;  %s4817_s26 = sphi %s4914_s26, %s6984_s26   ;;  %s4813_s25 = sphi %s4912_s25, %s6983_s25  }
   0x8   : > { %s4937_s14 = sadd.s32 1, %s4825_s28   ;;  %s311_s15 = sadd.s32 1, %s4821_s27 }
   0x9   : > { %s308_s16 = ssub.s32 %s4825_s28, %s4937_s14  ;;  %p321_p0 = scmp.ne.s32.totalorder %s4821_s27, %s4817_s26 }
   0xa   : > { %p309_p1 = scmp.eq.s32.totalorder %s308_s16, 0  ;;  %p322_p2 = scmp.eq.s32.totalorder %s4933_s29, 1 }
   0xb   : > { %p327_p3 = scmp.ne.s32.totalorder %s4817_s26, %s4813_s25  ;;  %p328_p4 = scmp.eq.s32.totalorder %s4240_s30, 1 }
   0xc   : > { %s4948_s17 = scalar_select %p309_p1, %s4821_s27, %s311_s15  }
   0xd   : > { %p4950_p5 = por %p322_p2, %p321_p0  ;;  %p4954_p6 = por %p328_p4, %p327_p3 }
   0xe   : > { %p4243_p7 = scmp.ge.s32.totalorder %s4825_s28, 1  ;;  %p391_p8 = scmp.lt.s32.totalorder %s4825_s28, 3 }
  0x10   : > { %p392_p9 = pnand %p4243_p7, %p391_p8 }
  0x12   : > { %395 = sbr.rel (%p392_p9) target bundleno = 1513 (0x5e9), region = 72 }
  0x19   : > { %s4245_s20 = sshll.u32 %s4933_s29, 2  ;;  %s6863_s3 = sld [smem:[#allocation60_spill]]  ;;  %vm478_vm0 = vcmask 64512   ;;  %v6827_v3 = vmov 0.0   ;;  %v4828_v12 = vmov 0   ;;  %v456_v13 = vld [vmem:[%s6817_s4 + $0x10] sm:$0xff] }
  0x1a   : > { %p4970_p10 = scmp.lt.s32.totalorder %s4245_s20, 7  ;;  %557 = vmatprep.mubr.f32.mxu0 %v6827_v3  ;;  %1169 = vmatprep.mubr.f32.mxu1 %v6827_v3  ;;  %v457_v18 = vld [vmem:[%s6817_s4 + $0x18] sm:$0xff]  ;;  %v454_v19 = vld [vmem:[%s6817_s4] sm:$0xff]  ;;  %s6865_s0 = sld [smem:[#allocation58_spill]]  ;;  %v455_v22 = vld [vmem:[%s6817_s4 + $0x8] sm:$0xff]  ;;  %v4829_v52 = vmov 1  }
  0x1b   : > { %4565 = vset.pattern.permute.xlu1 %v4828_v12  ;;  %4564 = vset.pattern.permute.xlu0 %v4828_v12  ;;  %v5069_v42 = vld [vmem:[%s6818_s5 + $0x8] sm:$0xff]  ;;  %v5090_v51 = vld [vmem:[%s6818_s5] sm:$0xff]  ;;  %v5107_v61 = vld [vmem:[%s6818_s5 + $0x10] sm:$0xff]  ;;  %v4830_v63 = vmov 7   ;;  %s4837_s22 = smov 127   ;;  %s6883_s1 = sld [smem:[#allocation59_spill]] }
  0x1c   : > { %s6988_s20 = smov (!%p4970_p10, %s4245_s20), 7  ;;  %470 = vperm.xlu1 %4565, %v456_v13   ;;  %460 = vperm.xlu0 %4564, %v454_v19   ;;  %v5116_v62 = vld [vmem:[%s6818_s5 + $0x18] sm:$0xff]  ;;  %s4839_s30 = smov 16   ;;  %vm2846_vm5 = vcmask 15360   ;;  %vm3068_vm6 = vcmask 261120  }
  0x1d   : > { %s4246_s16 = sshll.u32 %s6988_s20, 3  ;;  %s4840_s15 = smov 112  }
  0x1e   : > { %s4294_s24 = sshll.u32 %s4933_s29, 9 }
  0x1f   : > { %v450_v0 = vld [vmem:[%s6863_s3] sm:$0xff]  ;;  %v451_v1 = vld [vmem:[%s6863_s3 + $0x8] sm:$0xff]  ;;  %v452_v2 = vld [vmem:[%s6863_s3 + $0x10] sm:$0xff]  ;;  %s6771_s21 = scalar_lea.hbm %s6826_s13, %s4294_s24 }
  0x20   : > { %v480_v4 = vsel %vm478_vm0, %v450_v0, 0  ;;  %v483_v5 = vsel %vm478_vm0, %v451_v1, 0  ;;  %v486_v6 = vsel %vm478_vm0, %v452_v2, 0  ;;  %v453_v7 = vld [vmem:[%s6863_s3 + $0x18] sm:$0xff]  ;;  %s5012_s3 = scalar_lea.vmem %s6865_s0, %s4246_s16  ;;  %475 = vperm.xlu1 %4565, %v457_v18   ;;  %465 = vperm.xlu0 %4564, %v455_v22   ;;  %v4831_v0 = vmov 2   ;;  %s4838_s16 = smov 1  }
  0x21   : > { %v4979_v8 = vand.u32 4294901760, %v480_v4  ;;  %v4981_v9 = vand.u32 4294901760, %v483_v5  ;;  %v4983_v10 = vand.u32 4294901760, %v486_v6  ;;  %v489_v11 = vsel %vm478_vm0, %v453_v7, 0  ;;  %v443_v23 = vld [vmem:[%s5012_s3 + $0x8] sm:$0xff]  ;;  %v445_v24 = vld [vmem:[%s5012_s3 + $0x18] sm:$0xff] }
  0x22   : > { %v4992_v14 = vand.u32 4294901760, %v489_v11  ;;  %v442_v25 = vld [vmem:[%s5012_s3] sm:$0xff]  ;;  %v5032_v28 = vand.u32 4294901760, %v443_v23  ;;  %v5034_v29 = vand.u32 4294901760, %v445_v24  ;;  %v444_v31 = vld [vmem:[%s5012_s3 + $0x10] sm:$0xff]  ;;  %v4832_v1 = vmov 6  }
  0x23   : > { %v4995_v15 = vsub.f32 %v480_v4, %v4979_v8  ;;  %v4998_v16 = vsub.f32 %v483_v5, %v4981_v9  ;;  %v5001_v17 = vsub.f32 %v486_v6, %v4983_v10  ;;  %v5036_v30 = vand.u32 4294901760, %v442_v25  ;;  %v2661_v7 = vld [vmem:[%s6819_s6] sm:$0xff] }
  0x24   : > { %v5030_v27 = vsub.f32 %v489_v11, %v4992_v14  ;;  %v5041_v33 = vand.u32 4294901760, %v444_v31  ;;  %492 = vmatprep.subr.mxu0 %v5032_v28  ;;  %1104 = vmatprep.subr.mxu1 %v5034_v29  ;;  %v5051_v37 = vsub.f32 %v443_v23, %v5032_v28  ;;  %v5054_v38 = vsub.f32 %v445_v24, %v5034_v29 }
  0x25   : > { %v5015_v20 = vand.u32 4294901760, %v4995_v15  ;;  %v5018_v21 = vand.u32 4294901760, %v4998_v16  ;;  %v5027_v26 = vand.u32 4294901760, %v5001_v17  ;;  %v5048_v35 = vsub.f32 %v442_v25, %v5036_v30  ;;  %494 = vmatpush1.msra.mxu0 %v5036_v30  ;;  %2044 = vperm.xlu1 %4565, %v5069_v42  }
  0x26   : > { %1106 = vmatpush1.msra.mxu1 %v5041_v33  ;;  %v5059_v39 = vsub.f32 %v444_v31, %v5041_v33  ;;  %v5064_v41 = vand.u32 4294901760, %v5030_v27  ;;  %v604_v44 = vand.u32 4294901760, %v5051_v37  ;;  %v1216_v46 = vand.u32 4294901760, %v5054_v38  ;;  %4566 = vset.pattern.permute.xlu0 %v4829_v52 }
  0x27   : > { %v561_v32 = vsub.f32 %v4995_v15, %v5015_v20  ;;  %v572_v34 = vsub.f32 %v4998_v16, %v5018_v21  ;;  %v583_v40 = vsub.f32 %v5001_v17, %v5027_v26  ;;  %v610_v45 = vand.u32 4294901760, %v5048_v35  ;;  %2074 = vperm.xlu0 %4566, %v5090_v51  }
  0x28   : > { %v1222_v47 = vand.u32 4294901760, %v5059_v39  ;;  %v605_v48 = vsub.f32 %v5051_v37, %v604_v44  ;;  %v1217_v50 = vsub.f32 %v5054_v38, %v1216_v46  ;;  %v594_v54 = vsub.f32 %v5030_v27, %v5064_v41 }
  0x29   : > { %v562_v36 = vand.u32 4294901760, %v561_v32  ;;  %v573_v43 = vand.u32 4294901760, %v572_v34  ;;  %v611_v49 = vsub.f32 %v5048_v35, %v610_v45  ;;  %v584_v57 = vand.u32 4294901760, %v583_v40  ;;  %4567 = vset.pattern.permute.xlu1 %v4829_v52 }
  0x2a   : > { %v1223_v53 = vsub.f32 %v5059_v39, %v1222_v47  ;;  %v606_v55 = vand.u32 4294901760, %v605_v48  ;;  %v1218_v58 = vand.u32 4294901760, %v1217_v50  ;;  %v595_v60 = vand.u32 4294901760, %v594_v54  ;;  %2078 = vperm.xlu1 %4567, %v5069_v42  }
  0x2b   : > { %563 = vmatmul.mubr.f32.vlgmr.msra.gmra.mrb[0].mxu0 %v562_v36  ;;  %1175 = vmatmul.mubr.f32.vlgmr.msra.gmra.mrb[0].mxu1 %v562_v36  ;;  %v612_v56 = vand.u32 4294901760, %v611_v49  ;;  %v4833_v2 = vmov 8   ;;  %v4834_v4 = vmov 3   ;;  %v4835_v5 = vmov 5  }
  0x2c   : > { %568 = vmatprep.mubr.f32.mxu0 %v6827_v3  ;;  %1180 = vmatprep.mubr.f32.mxu1 %v6827_v3  ;;  %v1224_v59 = vand.u32 4294901760, %v1223_v53  ;;  %v4836_v6 = vmov 4  }
  0x2d   : > { %607 = vmatprep.subr.mxu0 %v606_v55  ;;  %1219 = vmatprep.subr.mxu1 %v1218_v58 }
  0x2e   : > { %613 = vmatpush1.msra.mxu0 %v612_v56  ;;  %1225 = vmatpush1.msra.mxu1 %v1224_v59 }
  0x2f   : > { %574 = vmatmul.mubr.f32.gmra.mrb[2].mxu0 %v573_v43  ;;  %1186 = vmatmul.mubr.f32.gmra.mrb[2].mxu1 %v573_v43 }
  0x30   : > { %579 = vmatprep.mubr.f32.mxu0 %v6827_v3  ;;  %1191 = vmatprep.mubr.f32.mxu1 %v6827_v3 }
  0x31   : > { %707 = vmatprep.subr.mxu0 %v5051_v37  ;;  %1319 = vmatprep.subr.mxu1 %v5054_v38 }
  0x32   : > { %2082 = vperm.xlu0 %4566, %v5107_v61   ;;  %4568 = vset.pattern.permute.xlu1 %v4828_v12 }
  0x33   : > { %585 = vmatmul.mubr.f32.gmra.mrb[4].mxu0 %v584_v57  ;;  %1197 = vmatmul.mubr.f32.gmra.mrb[4].mxu1 %v584_v57 }
  0x34   : > { %590 = vmatprep.mubr.f32.mxu0 %v6827_v3  ;;  %1202 = vmatprep.mubr.f32.mxu1 %v6827_v3 }
  0x35   : > { %2049 = vperm.xlu1 %4568, %v5107_v61  }
  0x36   : > { %2086 = vperm.xlu0 %4566, %v5116_v62  }
  0x37   : > { %596 = vmatmul.mubr.f32.gmra.mrb[6].mxu0 %v595_v60  ;;  %1208 = vmatmul.mubr.f32.gmra.mrb[6].mxu1 %v595_v60 }
  0x38   : > { %676 = vmatprep.mubr.f32.mxu0 %v6827_v3  ;;  %1288 = vmatprep.mubr.f32.mxu1 %v6827_v3 }
  0x39   : > { %4569 = vset.pattern.permute.xlu1 %v4831_v0 }
  0x3a   : > { %4573 = vset.pattern.permute.xlu0 %v4830_v63  ;;  %2122 = vperm.xlu1 %4569, %v5090_v51  }
  0x3b   : > { %678 = vmatmul.mubr.f32.vlgmr.msra.gmra.mrb[0].mxu0 %v4979_v8  ;;  %1290 = vmatmul.mubr.f32.vlgmr.msra.gmra.mrb[0].mxu1 %v4979_v8 }
  0x3c   : > { %683 = vmatprep.mubr.f32.mxu0 %v6827_v3  ;;  %1295 = vmatprep.mubr.f32.mxu1 %v6827_v3 }
  0x3d   : > { %710 = vmatpush1.msra.mxu0 %v5048_v35  ;;  %1322 = vmatpush1.msra.mxu1 %v5059_v39 }
  0x3e   : > { %807 = vmatprep.subr.mxu0 %v5032_v28  ;;  %1419 = vmatprep.subr.mxu1 %v5034_v29 }
  0x3f   : > { %685 = vmatmul.mubr.f32.gmra.mrb[2].mxu0 %v4981_v9  ;;  %1297 = vmatmul.mubr.f32.gmra.mrb[2].mxu1 %v4981_v9 }
  0x40   : > { %690 = vmatprep.mubr.f32.mxu0 %v6827_v3  ;;  %1302 = vmatprep.mubr.f32.mxu1 %v6827_v3 }
  0x41   : > { %2449 = vperm.xlu0 %4573, %v5090_v51   ;;  %4570 = vset.pattern.permute.xlu1 %v4832_v1 }
  0x42   : > { %2417 = vperm.xlu1 %4570, %v5090_v51  }
  0x43   : > { %692 = vmatmul.mubr.f32.gmra.mrb[4].mxu0 %v4983_v10  ;;  %1304 = vmatmul.mubr.f32.gmra.mrb[4].mxu1 %v4983_v10 }
  0x44   : > { %697 = vmatprep.mubr.f32.mxu0 %v6827_v3  ;;  %1309 = vmatprep.mubr.f32.mxu1 %v6827_v3 }
  0x45   : > { %2457 = vperm.xlu0 %4573, %v5107_v61  }
  0x46   : > { %2421 = vperm.xlu1 %4570, %v5069_v42  }
  0x47   : > { %699 = vmatmul.mubr.f32.gmra.mrb[6].mxu0 %v4992_v14  ;;  %1311 = vmatmul.mubr.f32.gmra.mrb[6].mxu1 %v4992_v14 }
  0x48   : > { %773 = vmatprep.mubr.f32.mxu0 %v6827_v3  ;;  %1385 = vmatprep.mubr.f32.mxu1 %v6827_v3 }
  0x49   : > { %4576 = vset.pattern.permute.xlu0 %v4831_v0 }
  0x4a   : > { %2126 = vperm.xlu0 %4576, %v5069_v42   ;;  %4571 = vset.pattern.permute.xlu1 %v4830_v63 }
  0x4b   : > { %776 = vmatmul.mubr.f32.vlgmr.msra.gmra.mrb[0].mxu0 %v4995_v15  ;;  %1388 = vmatmul.mubr.f32.vlgmr.msra.gmra.mrb[0].mxu1 %v4995_v15 }
  0x4c   : > { %781 = vmatprep.mubr.f32.mxu0 %v6827_v3  ;;  %1393 = vmatprep.mubr.f32.mxu1 %v6827_v3 }
  0x4d   : > { %809 = vmatpush1.msra.mxu0 %v5036_v30  ;;  %1421 = vmatpush1.msra.mxu1 %v5041_v33 }
  0x4e   : > { %912 = vmatprep.subr.mxu0 %v604_v44  ;;  %1524 = vmatprep.subr.mxu1 %v1216_v46 }
  0x4f   : > { %784 = vmatmul.mubr.f32.gmra.mrb[2].mxu0 %v4998_v16  ;;  %1396 = vmatmul.mubr.f32.gmra.mrb[2].mxu1 %v4998_v16 }
  0x50   : > { %789 = vmatprep.mubr.f32.mxu0 %v6827_v3  ;;  %1401 = vmatprep.mubr.f32.mxu1 %v6827_v3 }
  0x51   : > { %2134 = vperm.xlu0 %4576, %v5116_v62   ;;  %2453 = vperm.xlu1 %4571, %v5069_v42  }
  0x53   : > { %792 = vmatmul.mubr.f32.gmra.mrb[4].mxu0 %v5001_v17  ;;  %1404 = vmatmul.mubr.f32.gmra.mrb[4].mxu1 %v5001_v17 }
  0x54   : > { %797 = vmatprep.mubr.f32.mxu0 %v6827_v3  ;;  %1409 = vmatprep.mubr.f32.mxu1 %v6827_v3 }
  0x55   : > { %4580 = vset.pattern.permute.xlu0 %v4833_v2  ;;  %4572 = vset.pattern.permute.xlu1 %v4828_v12 }
  0x56   : > { %2505 = vperm.xlu0 %4580, %v5107_v61   ;;  %2054 = vperm.xlu1 %4572, %v5116_v62  }
  0x57   : > { %800 = vmatmul.mubr.f32.gmra.mrb[6].mxu0 %v5030_v27  ;;  %1412 = vmatmul.mubr.f32.gmra.mrb[6].mxu1 %v5030_v27 }
  0x58   : > { %872 = vmatprep.mubr.f32.mxu0 %v6827_v3  ;;  %1484 = vmatprep.mubr.f32.mxu1 %v6827_v3 }
  0x5a   : > { %2509 = vperm.xlu0 %4580, %v5116_v62   ;;  %4574 = vset.pattern.permute.xlu1 %v4831_v0 }
  0x5b   : > { %876 = vmatmul.mubr.f32.vlgmr.msra.gmra.mrb[0].mxu0 %v5015_v20  ;;  %1488 = vmatmul.mubr.f32.vlgmr.msra.gmra.mrb[0].mxu1 %v5015_v20 }
  0x5c   : > { %881 = vmatprep.mubr.f32.mxu0 %v6827_v3  ;;  %1493 = vmatprep.mubr.f32.mxu1 %v6827_v3 }
  0x5d   : > { %916 = vmatpush1.msra.mxu0 %v610_v45  ;;  %1528 = vmatpush1.msra.mxu1 %v1222_v47 }
  0x5e   : > { %1009 = vmatprep.subr.mxu0 %v5032_v28  ;;  %1621 = vmatprep.subr.mxu1 %v5034_v29 }
  0x5f   : > { %885 = vmatmul.mubr.f32.gmra.mrb[2].mxu0 %v5018_v21  ;;  %1497 = vmatmul.mubr.f32.gmra.mrb[2].mxu1 %v5018_v21 }
  0x60   : > { %890 = vmatprep.mubr.f32.mxu0 %v6827_v3  ;;  %1502 = vmatprep.mubr.f32.mxu1 %v6827_v3 }
  0x61   : > { %4582 = vset.pattern.permute.xlu0 %v4834_v4  ;;  %2130 = vperm.xlu1 %4574, %v5107_v61  }
  0x62   : > { %2277 = vperm.xlu0 %4582, %v5069_v42  }
  0x63   : > { %894 = vmatmul.mubr.f32.gmra.mrb[4].mxu0 %v5027_v26  ;;  %1506 = vmatmul.mubr.f32.gmra.mrb[4].mxu1 %v5027_v26 }
  0x64   : > { %899 = vmatprep.mubr.f32.mxu0 %v6827_v3  ;;  %1511 = vmatprep.mubr.f32.mxu1 %v6827_v3 }
  0x65   : > { %4575 = vset.pattern.permute.xlu1 %v4832_v1 }
  0x66   : > { %2281 = vperm.xlu0 %4582, %v5107_v61   ;;  %2425 = vperm.xlu1 %4575, %v5107_v61  }
  0x67   : > { %903 = vmatmul.mubr.f32.gmra.mrb[6].mxu0 %v5064_v41  ;;  %1515 = vmatmul.mubr.f32.gmra.mrb[6].mxu1 %v5064_v41 }
  0x68   : > { %979 = vmatprep.mubr.f32.mxu0 %v6827_v3  ;;  %1591 = vmatprep.mubr.f32.mxu1 %v6827_v3 }
  0x6a   : > { %4584 = vset.pattern.permute.xlu0 %v4835_v5  ;;  %4577 = vset.pattern.permute.xlu1 %v4833_v2 }
  0x6b   : > { %981 = vmatmul.mubr.f32.vlgmr.msra.gmra.mrb[0].mxu0 %v4979_v8  ;;  %1593 = vmatmul.mubr.f32.vlgmr.msra.gmra.mrb[0].mxu1 %v4979_v8 }
  0x6c   : > { %986 = vmatprep.mubr.f32.mxu0 %v6827_v3  ;;  %1598 = vmatprep.mubr.f32.mxu1 %v6827_v3 }
  0x6d   : > { %1011 = vmatpush1.msra.mxu0 %v5036_v30  ;;  %1623 = vmatpush1.msra.mxu1 %v5041_v33 }
  0x6e   : > { %2353 = vperm.xlu0 %4584, %v5090_v51   ;;  %2497 = vperm.xlu1 %4577, %v5090_v51  }
  0x6f   : > { %988 = vmatmul.mubr.f32.gmra.mrb[2].mxu0 %v4981_v9  ;;  %1600 = vmatmul.mubr.f32.gmra.mrb[2].mxu1 %v4981_v9 }
  0x70   : > { %993 = vmatprep.mubr.f32.mxu0 %v6827_v3  ;;  %1605 = vmatprep.mubr.f32.mxu1 %v6827_v3 }
  0x72   : > { %4587 = vset.pattern.permute.xlu0 %v4836_v6  ;;  %2501 = vperm.xlu1 %4577, %v5069_v42  }
  0x73   : > { %995 = vmatmul.mubr.f32.gmra.mrb[4].mxu0 %v4983_v10  ;;  %1607 = vmatmul.mubr.f32.gmra.mrb[4].mxu1 %v4983_v10 }
  0x74   : > { %1000 = vmatprep.mubr.f32.mxu0 %v6827_v3  ;;  %1612 = vmatprep.mubr.f32.mxu1 %v6827_v3 }
  0x75   : > { %2317 = vperm.xlu0 %4587, %v5116_v62  }
  0x76   : > { %4578 = vset.pattern.permute.xlu1 %v4832_v1 }
  0x77   : > { %1002 = vmatmul.mubr.f32.gmra.mrb[6].mxu0 %v4992_v14  ;;  %1614 = vmatmul.mubr.f32.gmra.mrb[6].mxu1 %v4992_v14 }
  0x78   : > { %1074 = vmatprep.mubr.f32.mxu0 %v6827_v3  ;;  %1686 = vmatprep.mubr.f32.mxu1 %v6827_v3 }
  0x79   : > { %4588 = vset.pattern.permute.xlu0 %v4828_v12  ;;  %2429 = vperm.xlu1 %4578, %v5116_v62  }
  0x7a   : > { %2039 = vperm.xlu0 %4588, %v5090_v51  }
  0x7b   : > { %1076 = vmatmul.mubr.f32.vlgmr.msra.gmra.mrb[0].mxu0 %v4979_v8  ;;  %1688 = vmatmul.mubr.f32.vlgmr.msra.gmra.mrb[0].mxu1 %v4979_v8 }
  0x7c   : > { %1081 = vmatprep.mubr.f32.mxu0 %v6827_v3  ;;  %1693 = vmatprep.mubr.f32.mxu1 %v6827_v3 }
  0x7d   : > { %4579 = vset.pattern.permute.xlu1 %v4830_v63 }
  0x7e   : > { %2461 = vperm.xlu1 %4579, %v5116_v62   ;;  %2667 = vperm.xlu0 %4588, %v2661_v7  }
  0x7f   : > { %1083 = vmatmul.mubr.f32.gmra.mrb[2].mxu0 %v4981_v9  ;;  %1695 = vmatmul.mubr.f32.gmra.mrb[2].mxu1 %v4981_v9 }
  0x80   : > { %1088 = vmatprep.mubr.f32.mxu0 %v6827_v3  ;;  %1700 = vmatprep.mubr.f32.mxu1 %v6827_v3 }
  0x82   : > { %4581 = vset.pattern.permute.xlu1 %v4834_v4 }
  0x83   : > { %1090 = vmatmul.mubr.f32.gmra.mrb[4].mxu0 %v4983_v10  ;;  %1702 = vmatmul.mubr.f32.gmra.mrb[4].mxu1 %v4983_v10 }
  0x84   : > { %1095 = vmatprep.mubr.f32.mxu0 %v6827_v3  ;;  %1707 = vmatprep.mubr.f32.mxu1 %v6827_v3 }
  0x85   : > { %2273 = vperm.xlu1 %4581, %v5090_v51  }
  0x87   : > { %1097 = vmatmul.mubr.f32.gmra.mrb[6].mxu0 %v4992_v14  ;;  %1709 = vmatmul.mubr.f32.gmra.mrb[6].mxu1 %v4992_v14 }
  0x88   : > { %3144 = vmatprep.mubr.f32.mxu0 %v6827_v3  ;;  %3687 = vmatprep.mubr.f32.mxu1 %v6827_v3 }
  0x89   : > { %4583 = vset.pattern.permute.xlu1 %v4836_v6 }
  0x8a   : > { %2305 = vperm.xlu1 %4583, %v5090_v51  }
  0x8e   : > { %2309 = vperm.xlu1 %4583, %v5069_v42  }
  0x92   : > { %2313 = vperm.xlu1 %4583, %v5107_v61  }
  0x96   : > { %4585 = vset.pattern.permute.xlu1 %v4835_v5 }
  0x97   : > { %2357 = vperm.xlu1 %4585, %v5069_v42  }
  0x9b   : > { %4586 = vset.pattern.permute.xlu1 %v4834_v4  ;;  %v461_v8 = vpop.permute.xlu0 %460  ;;  %v471_v17 = vpop.permute.xlu1 %470 }
  0x9c   : > { %2285 = vperm.xlu1 %4586, %v5116_v62  }
  0x9f   : > { %v466_v25 = vpop.permute.xlu0 %465  ;;  %v5281_v32 = vpop.permute.xlu1 %475 }
  0xa0   : > { %4589 = vset.pattern.permute.xlu1 %v4835_v5 }
  0xa1   : > { %2361 = vperm.xlu1 %4589, %v5107_v61  }
  0xa4   : > { %v5295_v45 = vpop.permute.xlu1 %2044 }
  0xa5   : > { %2365 = vperm.xlu1 %4589, %v5116_v62  }
  0xa9   : > { %4590 = vset.pattern.permute.xlu1 %v4828_v12  ;;  %v5302_v52 = vpop.permute.xlu1 %2078 }
  0xb4   : > { %v5313_v0 = vpop.permute.xlu1 %2049 }
  0xb5   : > { %6866 = vst [vmem:[#allocation5_spill] sm:$0xff] %v5313_v0 }
 0x14e   : > { %v1077_v9 = vpop.f32.mrb[0].mxu0  ;;  %v1689_v10 = vpop.f32.mrb[0].mxu1 }
 0x14f   : > { %v5267_v11 = vadd.f32 %v1077_v9, %v461_v8  ;;  %v5269_v13 = vadd.f32 %v1689_v10, %v461_v8  ;;  %v1079_v14 = vpop.f32.mrb[1].mxu0  ;;  %v1691_v15 = vpop.f32.mrb[1].mxu1 }
 0x150   : > { %v5271_v16 = vadd.f32 %v1079_v14, %v461_v8  ;;  %v5275_v19 = vadd.f32 %v1691_v15, %v461_v8  ;;  %v5327_v10 = vpop.permute.xlu1 %2122 }
 0x151   : > { %v4247_v18 = vmul.f32 -1.442695, %v5267_v11  ;;  %v4249_v12 = vmul.f32 -1.442695, %v5269_v13 }
 0x152   : > { %v4248_v20 = vmul.f32 -1.442695, %v5271_v16  ;;  %v1084_v21 = vpop.f32.mrb[2].mxu0  ;;  %v1696_v22 = vpop.f32.mrb[2].mxu1  ;;  %v4250_v26 = vmul.f32 -1.442695, %v5275_v19 }
 0x153   : > { %4591 = vpow2.f32 %v4247_v18  ;;  %v1086_v23 = vpop.f32.mrb[3].mxu0  ;;  %v1698_v24 = vpop.f32.mrb[3].mxu1  ;;  %v5279_v27 = vadd.f32 %v1084_v21, %v466_v25  ;;  %v5284_v34 = vadd.f32 %v1696_v22, %v466_v25 }
 0x154   : > { %4593 = vpow2.f32 %v4249_v12  ;;  %v5293_v41 = vadd.f32 %v1086_v23, %v466_v25  ;;  %v5298_v48 = vadd.f32 %v1698_v24, %v466_v25 }
 0x155   : > { %4595 = vpow2.f32 %v4248_v20  ;;  %v4251_v33 = vmul.f32 -1.442695, %v5279_v27  ;;  %v4253_v40 = vmul.f32 -1.442695, %v5284_v34 }
 0x156   : > { %v1091_v28 = vpop.f32.mrb[4].mxu0  ;;  %v1703_v29 = vpop.f32.mrb[4].mxu1  ;;  %4597 = vpow2.f32 %v4250_v26  ;;  %v4252_v47 = vmul.f32 -1.442695, %v5293_v41  ;;  %v4254_v53 = vmul.f32 -1.442695, %v5298_v48 }
 0x157   : > { %v1093_v30 = vpop.f32.mrb[5].mxu0  ;;  %v1705_v31 = vpop.f32.mrb[5].mxu1  ;;  %4599 = vpow2.f32 %v4251_v33  ;;  %v5300_v51 = vadd.f32 %v1091_v28, %v471_v17  ;;  %v5308_v58 = vadd.f32 %v1703_v29, %v471_v17 }
 0x158   : > { %v5305_v54 = vadd.f32 %v1093_v30, %v471_v17  ;;  %v5311_v60 = vadd.f32 %v1705_v31, %v471_v17 }
 0x159   : > { %v4255_v57 = vmul.f32 -1.442695, %v5300_v51  ;;  %v4257_v2 = vmul.f32 -1.442695, %v5308_v58 }
 0x15a   : > { %v1098_v35 = vpop.f32.mrb[6].mxu0  ;;  %v5286_v36 = vpop.f32.mrb[6].mxu1  ;;  %v4256_v59 = vmul.f32 -1.442695, %v5305_v54  ;;  %v4258_v5 = vmul.f32 -1.442695, %v5311_v60 }
 0x15b   : > { %v5288_v37 = vpop.f32.mrb[7].mxu0  ;;  %v5290_v38 = vpop.f32.mrb[7].mxu1  ;;  %v5341_v12 = vadd.f32 %v5286_v36, %v5281_v32 }
 0x15c   : > { %v5356_v29 = vadd.f32 %v5288_v37, %v5281_v32 }
 0x15d   : > { %v4592_v39 = vpop.eup %4591  ;;  %v4261_v28 = vmul.f32 -1.442695, %v5341_v12 }
 0x15e   : > { %v4594_v42 = vpop.eup %4593  ;;  %v1763_v43 = vadd.f32 1.0, %v4592_v39  ;;  %v4260_v37 = vmul.f32 -1.442695, %v5356_v29  ;;  %v5370_v39 = vadd.f32 %v5290_v38, %v5281_v32 }
 0x15f   : > { %v4596_v44 = vpop.eup %4595  ;;  %v1765_v46 = vadd.f32 1.0, %v4594_v42 }
 0x160   : > { %4601 = vrcp.f32 %v1763_v43  ;;  %v1764_v49 = vadd.f32 1.0, %v4596_v44  ;;  %v4598_v50 = vpop.eup %4597  ;;  %v4262_v43 = vmul.f32 -1.442695, %v5370_v39 }
 0x161   : > { %4603 = vpow2.f32 %v4253_v40  ;;  %v1766_v55 = vadd.f32 1.0, %v4598_v50  ;;  %v4600_v56 = vpop.eup %4599 }
 0x162   : > { %4605 = vrcp.f32 %v1765_v46  ;;  %v1767_v62 = vadd.f32 1.0, %v4600_v56 }
 0x163   : > { %4607 = vpow2.f32 %v4252_v47 }
 0x164   : > { %4609 = vrcp.f32 %v1764_v49 }
 0x165   : > { %4611 = vpow2.f32 %v4254_v53  ;;  %v5396_v53 = vpop.permute.xlu0 %2074 }
 0x166   : > { %4613 = vrcp.f32 %v1766_v55 }
 0x167   : > { %4615 = vpow2.f32 %v4255_v57 }
 0x168   : > { %4617 = vpow2.f32 %v4256_v59 }
 0x169   : > { %4619 = vrcp.f32 %v1767_v62 }
 0x16a   : > { %v4602_v61 = vpop.eup %4601  ;;  %4621 = vpow2.f32 %v4257_v2 }
 0x16b   : > { %v4604_v63 = vpop.eup %4603  ;;  %v5316_v1 = vmul.f32 %v4602_v61, %v5267_v11  ;;  %4623 = vpow2.f32 %v4258_v5 }
 0x16c   : > { %v4606_v4 = vpop.eup %4605  ;;  %v1769_v6 = vadd.f32 1.0, %v4604_v63 }
 0x16d   : > { %1936 = vrot.lane.b32.xlu0 %v5316_v1, %s4837_s22  ;;  %1831 = vrot.lane.b32.xlu1 %v5316_v1, %s4838_s16  ;;  %v4608_v7 = vpop.eup %4607  ;;  %v5325_v8 = vmul.f32 %v4606_v4, %v5269_v13  ;;  %v5337_v13 = vadd.f32 %v1098_v35, %v5281_v32  ;;  %v5414_v4 = vpop.permute.xlu0 %2082 }
 0x16e   : > { %v4610_v9 = vpop.eup %4609  ;;  %4625 = vrcp.f32 %v1769_v6  ;;  %v1768_v11 = vadd.f32 1.0, %v4608_v7 }
 0x16f   : > { %v4612_v14 = vpop.eup %4611  ;;  %v5334_v15 = vmul.f32 %v4610_v9, %v5271_v16  ;;  %v5347_v16 = vpop.permute.xlu1 %2417  ;;  %v4259_v23 = vmul.f32 -1.442695, %v5337_v13 }
 0x170   : > { %v4614_v17 = vpop.eup %4613  ;;  %4627 = vrcp.f32 %v1768_v11  ;;  %v1770_v20 = vadd.f32 1.0, %v4612_v14 }
 0x171   : > { %1952 = vrot.lane.b32.xlu0 %v5325_v8, %s4837_s22  ;;  %1847 = vrot.lane.b32.xlu1 %v5325_v8, %s4838_s16  ;;  %v4616_v18 = vpop.eup %4615  ;;  %v5350_v22 = vmul.f32 %v4614_v17, %v5275_v19  ;;  %v5428_v7 = vpop.permute.xlu0 %2086 }
 0x172   : > { %v4618_v21 = vpop.eup %4617  ;;  %v1771_v25 = vadd.f32 1.0, %v4616_v18  ;;  %4629 = vrcp.f32 %v1770_v20 }
 0x173   : > { %v4620_v24 = vpop.eup %4619  ;;  %v1772_v19 = vadd.f32 1.0, %v4618_v21  ;;  %4631 = vpow2.f32 %v4259_v23  ;;  %v5365_v36 = vpop.permute.xlu1 %2421 }
 0x174   : > { %v4622_v26 = vpop.eup %4621  ;;  %v5363_v31 = vmul.f32 %v4620_v24, %v5279_v27  ;;  %4633 = vrcp.f32 %v1771_v25 }
 0x175   : > { %1944 = vrot.lane.b32.xlu0 %v5334_v15, %s4837_s22  ;;  %1839 = vrot.lane.b32.xlu1 %v5334_v15, %s4838_s16  ;;  %v4624_v30 = vpop.eup %4623  ;;  %v1773_v35 = vadd.f32 1.0, %v4622_v26  ;;  %4635 = vpow2.f32 %v4261_v28  ;;  %v5440_v11 = vpop.permute.xlu0 %2449 }
 0x176   : > { %4637 = vrcp.f32 %v1772_v19  ;;  %v1774_v27 = vadd.f32 1.0, %v4624_v30  ;;  %v2662_v30 = vld [vmem:[%s6819_s6 + $0x8] sm:$0xff] }
 0x177   : > { %4639 = vrcp.f32 %v1773_v35  ;;  %v5384_v32 = vpop.permute.xlu1 %2453 }
 0x178   : > { %v4626_v33 = vpop.eup %4625  ;;  %4641 = vpow2.f32 %v4260_v37 }
 0x179   : > { %1960 = vrot.lane.b32.xlu0 %v5350_v22, %s4837_s22  ;;  %1855 = vrot.lane.b32.xlu1 %v5350_v22, %s4838_s16  ;;  %v5377_v40 = vmul.f32 %v4626_v33, %v5284_v34  ;;  %4643 = vrcp.f32 %v1774_v27  ;;  %v5457_v24 = vpop.permute.xlu0 %2457  ;;  %v2663_v33 = vld [vmem:[%s6819_s6 + $0x10] sm:$0xff] }
 0x17a   : > { %v4628_v42 = vpop.eup %4627  ;;  %4645 = vpow2.f32 %v4262_v43 }
 0x17b   : > { %v5387_v38 = vmul.f32 %v4628_v42, %v5293_v41  ;;  %v5398_v55 = vpop.permute.xlu1 %2054 }
 0x17c   : > { %v4630_v44 = vpop.eup %4629  ;;  %6867 = vst [vmem:[#allocation6_spill] sm:$0xff] %v5398_v55 }
 0x17d   : > { %1833 = vrot.lane.b32.xlu0 %v5363_v31, %s4838_s16  ;;  %1938 = vrot.lane.b32.xlu1 %v5363_v31, %s4837_s22  ;;  %v4632_v34 = vpop.eup %4631  ;;  %v5394_v49 = vmul.f32 %v4630_v44, %v5298_v48  ;;  %v5475_v26 = vpop.permute.xlu0 %2126 }
 0x17e   : > { %v4634_v46 = vpop.eup %4633  ;;  %v1775_v41 = vadd.f32 1.0, %v4632_v34  ;;  %6872 = vst [vmem:[#allocation11_spill] sm:$0xff] %v5475_v26 }
 0x17f   : > { %v4636_v47 = vpop.eup %4635  ;;  %v5405_v61 = vmul.f32 %v4634_v46, %v5300_v51  ;;  %v5416_v5 = vpop.permute.xlu1 %2130 }
 0x180   : > { %v4638_v50 = vpop.eup %4637  ;;  %v1777_v57 = vadd.f32 1.0, %v4636_v47  ;;  %4647 = vrcp.f32 %v1775_v41  ;;  %6868 = vst [vmem:[#allocation7_spill] sm:$0xff] %v5416_v5 }
 0x181   : > { %1849 = vrot.lane.b32.xlu0 %v5377_v40, %s4838_s16  ;;  %1954 = vrot.lane.b32.xlu1 %v5377_v40, %s4837_s22  ;;  %v4640_v56 = vpop.eup %4639  ;;  %v5408_v48 = vmul.f32 %v4638_v50, %v5305_v54 }
 0x182   : > { %v4642_v59 = vpop.eup %4641  ;;  %4649 = vrcp.f32 %v1777_v57  ;;  %v5419_v51 = vmul.f32 %v4640_v56, %v5308_v58  ;;  %v1863_v56 = vlaneseq }
 0x183   : > { %v4644_v62 = vpop.eup %4643  ;;  %v1776_v63 = vadd.f32 1.0, %v4642_v59  ;;  %v5430_v9 = vpop.permute.xlu1 %2425 }
 0x184   : > { %v4646_v2 = vpop.eup %4645  ;;  %v5422_v54 = vmul.f32 %v4644_v62, %v5311_v60  ;;  %6869 = vst [vmem:[#allocation8_spill] sm:$0xff] %v5430_v9  ;;  %v1885_v62 = vshrl.u32 %v1863_v56, 7 }
 0x185   : > { %1841 = vrot.lane.b32.xlu0 %v5387_v38, %s4838_s16  ;;  %1946 = vrot.lane.b32.xlu1 %v5387_v38, %s4837_s22  ;;  %4651 = vrcp.f32 %v1776_v63  ;;  %v1778_v6 = vadd.f32 1.0, %v4646_v2  ;;  %v446_v2 = vld [vmem:[%s6883_s1] sm:$0x77] }
 0x186   : > { %v5515_v63 = vsub.s32 2, %v1885_v62 }
 0x187   : > { %4653 = vrcp.f32 %v1778_v6  ;;  %v5442_v14 = vpop.permute.xlu1 %2497  ;;  %v5520_v6 = vsub.s32 6, %v1885_v62 }
 0x188   : > { %6882 = vst [vmem:[#allocation21_spill] sm:$0xff] %v5515_v63 }
 0x189   : > { %1857 = vrot.lane.b32.xlu0 %v5394_v49, %s4838_s16  ;;  %1962 = vrot.lane.b32.xlu1 %v5394_v49, %s4837_s22  ;;  %6884 = vst [vmem:[#allocation22_spill] sm:$0xff] %v5520_v6  ;;  %v1992_v3 = vrot.slane %v446_v2, %v5520_v6 }
 0x18a   : > { %v4648_v58 = vpop.eup %4647 }
 0x18b   : > { %v5445_v17 = vmul.f32 %v4648_v58, %v5337_v13  ;;  %v5459_v25 = vpop.permute.xlu1 %2501  ;;  %v5559_v5 = vrot.slane %v1992_v3, %v5515_v63 }
 0x18c   : > { %v4650_v60 = vpop.eup %4649  ;;  %6870 = vst [vmem:[#allocation9_spill] sm:$0xff] %v5459_v25  ;;  %v5689_v25 = vmul.f32 %v5384_v32, %v5387_v38 }
 0x18d   : > { %1835 = vrot.lane.b32.xlu0 %v5405_v61, %s4838_s16  ;;  %1843 = vrot.lane.b32.xlu1 %v5408_v48, %s4838_s16  ;;  %v5448_v18 = vmul.f32 %v4650_v60, %v5341_v12  ;;  %v2664_v12 = vld [vmem:[%s6819_s6 + $0x18] sm:$0xff] }
 0x18e   : > { %6907 = vst [vmem:[#allocation45_spill] sm:$0xff] %v5689_v25 }
 0x18f   : > { %v4652_v20 = vpop.eup %4651  ;;  %v5477_v28 = vpop.permute.xlu1 %2429 }
 0x190   : > { %v5455_v21 = vmul.f32 %v4652_v20, %v5356_v29  ;;  %6873 = vst [vmem:[#allocation12_spill] sm:$0xff] %v5477_v28  ;;  %v5481_v29 = vpop.permute.xlu0 %2134  ;;  %v5526_v20 = vsub.s32 0, %v1885_v62 }
 0x191   : > { %1851 = vrot.lane.b32.xlu0 %v5419_v51, %s4838_s16  ;;  %1859 = vrot.lane.b32.xlu1 %v5422_v54, %s4838_s16  ;;  %v4654_v23 = vpop.eup %4653  ;;  %6874 = vst [vmem:[#allocation13_spill] sm:$0xff] %v5481_v29 }
 0x192   : > { %v5466_v13 = vmul.f32 %v4654_v23, %v5370_v39  ;;  %6887 = vst [vmem:[#allocation25_spill] sm:$0xff] %v5526_v20  ;;  %v5528_v23 = vsub.s32 4, %v1885_v62 }
 0x193   : > { %v5483_v19 = vpop.permute.xlu1 %2461 }
 0x194   : > { %6871 = vst [vmem:[#allocation10_spill] sm:$0xff] %v5466_v13  ;;  %6875 = vst [vmem:[#allocation14_spill] sm:$0xff] %v5483_v19  ;;  %v5493_v35 = vpop.permute.xlu0 %2505  ;;  %v1891_v29 = vrot.slane %v446_v2, %v5528_v23 }
 0x195   : > { %1940 = vrot.lane.b32.xlu0 %v5405_v61, %s4837_s22  ;;  %1948 = vrot.lane.b32.xlu1 %v5408_v48, %s4837_s22  ;;  %6876 = vst [vmem:[#allocation15_spill] sm:$0xff] %v5493_v35  ;;  %6888 = vst [vmem:[#allocation26_spill] sm:$0xff] %v5528_v23 }
 0x196   : > { %v5571_v0 = vrot.slane %v1891_v29, %v5526_v20 }
 0x197   : > { %v5495_v37 = vpop.permute.xlu1 %2273 }
 0x198   : > { %v5497_v39 = vpop.permute.xlu0 %2509 }
 0x199   : > { %1956 = vrot.lane.b32.xlu0 %v5419_v51, %s4837_s22  ;;  %1964 = vrot.lane.b32.xlu1 %v5422_v54, %s4837_s22  ;;  %6877 = vst [vmem:[#allocation16_spill] sm:$0xff] %v5497_v39 }
 0x19b   : > { %v2306_v27 = vpop.permute.xlu1 %2305 }
 0x19c   : > { %v5499_v42 = vpop.permute.xlu0 %2277  ;;  %v5545_v39 = vmul.f32 %v2306_v27, %v5316_v1  ;;  %v5553_v35 = vmul.f32 %v2306_v27, %v5334_v15 }
 0x19d   : > { %1853 = vrot.lane.b32.xlu0 %v5448_v18, %s4838_s16  ;;  %1837 = vrot.lane.b32.xlu1 %v5445_v17, %s4838_s16 }
 0x19e   : > { %6889 = vst [vmem:[#allocation27_spill] sm:$0xff] %v5545_v39  ;;  %v5563_v39 = vmul.f32 %v2306_v27, %v5350_v22 }
 0x19f   : > { %v2310_v43 = vpop.permute.xlu1 %2309 }
 0x1a0   : > { %v5501_v44 = vpop.permute.xlu0 %2281  ;;  %6890 = vst [vmem:[#allocation28_spill] sm:$0xff] %v5563_v39  ;;  %v5577_v3 = vmul.f32 %v2310_v43, %v5387_v38 }
 0x1a1   : > { %1950 = vrot.lane.b32.xlu0 %v5455_v21, %s4837_s22  ;;  %1942 = vrot.lane.b32.xlu1 %v5445_v17, %s4837_s22  ;;  %6878 = vst [vmem:[#allocation17_spill] sm:$0xff] %v5501_v44  ;;  %v5566_v44 = vmul.f32 %v2310_v43, %v5363_v31 }
 0x1a2   : > { %6892 = vst [vmem:[#allocation30_spill] sm:$0xff] %v5577_v3  ;;  %v5599_v3 = vmul.f32 %v5440_v11, %v5316_v1 }
 0x1a3   : > { %v2314_v34 = vpop.permute.xlu1 %2313  ;;  %6891 = vst [vmem:[#allocation29_spill] sm:$0xff] %v5566_v44  ;;  %v5589_v44 = vmul.f32 %v2310_v43, %v5394_v49 }
 0x1a4   : > { %v5505_v47 = vpop.permute.xlu0 %2353  ;;  %v5592_v29 = vmul.f32 %v2314_v34, %v5405_v61 }
 0x1a5   : > { %1966 = vrot.lane.b32.xlu0 %v5466_v13, %s4837_s22  ;;  %1958 = vrot.lane.b32.xlu1 %v5448_v18, %s4837_s22  ;;  %6894 = vst [vmem:[#allocation32_spill] sm:$0xff] %v5589_v44  ;;  %v5631_v44 = vmul.f32 %v2314_v34, %v5422_v54  ;;  %s432_s22 = sand.u32 1, %s4817_s26  }
 0x1a6   : > { %6895 = vst [vmem:[#allocation33_spill] sm:$0xff] %v5592_v29  ;;  %v5622_v29 = vmul.f32 %v2314_v34, %v5408_v48  ;;  %s4167_s29 = scalar_lea.sflag [#allocation3], %s432_s22 }
 0x1a7   : > { %v5503_v46 = vpop.permute.xlu1 %2357  ;;  %6902 = vst [vmem:[#allocation40_spill] sm:$0xff] %v5631_v44  ;;  %v5663_v44 = vmul.f32 %v5414_v4, %v5419_v51 }
 0x1a8   : > { %6879 = vst [vmem:[#allocation18_spill] sm:$0xff] %v5503_v46  ;;  %v5509_v41 = vpop.permute.xlu0 %2317  ;;  %6900 = vst [vmem:[#allocation38_spill] sm:$0xff] %v5622_v29 }
 0x1a9   : > { %2682 = vperm.xlu0 %4588, %v2664_v12   ;;  %1845 = vrot.lane.b32.xlu1 %v5455_v21, %s4838_s16  ;;  %v5530_v12 = vand.u32 127, %v1863_v56  ;;  %v5635_v39 = vmul.f32 %v5509_v41, %v5445_v17  ;;  %6905 = vst [vmem:[#allocation43_spill] sm:$0xff] %v5663_v44 }
 0x1ab   : > { %v5507_v50 = vpop.permute.xlu1 %2285  ;;  %vm1865_vm1 = vcmp.lt.s32.totalorder %v5530_v12, 1  ;;  %vm1968_vm2 = vcmp.lt.s32.totalorder %v5530_v12, 127  ;;  %6903 = vst [vmem:[#allocation41_spill] sm:$0xff] %v5635_v39  ;;  %v5655_v39 = vmul.f32 %v5440_v11, %v5350_v22  ;;  %vm2201_vm3 = vcmp.lt.s32.totalorder %v5530_v12, 16 }
 0x1ac   : > { %6880 = vst [vmem:[#allocation19_spill] sm:$0xff] %v5507_v50  ;;  %v5513_v59 = vpop.permute.xlu0 %2039  ;;  %vm2576_vm4 = vcmp.lt.s32.totalorder %v5530_v12, 112 }
 0x1ad   : > { %1861 = vrot.lane.b32.xlu1 %v5466_v13, %s4838_s16  ;;  %s4244_s16 = sshll.u32 %s432_s22, 5 }
 0x1ae   : > { %s434_s23 = scalar_lea.vmem [#allocation2], %s4244_s16 }
 0x1af   : > { %v5511_v57 = vpop.permute.xlu1 %2361 }
 0x1b0   : > { %6881 = vst [vmem:[#allocation20_spill] sm:$0xff] %v5511_v57  ;;  %v5524_v60 = vpop.permute.xlu0 %2667  ;;  %v5556_v57 = vmul.f32 %v2306_v27, %v5325_v8 }
 0x1b1   : > { %2672 = vperm.xlu1 %4590, %v2662_v30   ;;  %6886 = vst [vmem:[#allocation24_spill] sm:$0xff] %v5524_v60  ;;  %v447_v30 = vld [vmem:[%s6883_s1 + $0x8] sm:$0x77] }
 0x1b2   : > { %v1895_v60 = vrot.slane %v447_v30, %v5526_v20  ;;  %v1996_v56 = vrot.slane %v447_v30, %v5515_v63  ;;  %v2000_v62 = vrot.slane %v447_v30, %v5520_v6  ;;  %v1899_v6 = vrot.slane %v447_v30, %v5528_v23 }
 0x1b3   : > { %v5522_v58 = vpop.permute.xlu1 %2365  ;;  %v5580_v30 = vmul.f32 %v2310_v43, %v5377_v40  ;;  %v2089_v43 = vmul.f32 %v5396_v53, %v5316_v1  ;;  %v2465_v1 = vmul.f32 %v5440_v11, %v5334_v15 }
 0x1b4   : > { %6885 = vst [vmem:[#allocation23_spill] sm:$0xff] %v5522_v58  ;;  %v1887_v58 = vrot.slane %v446_v2, %v5526_v20  ;;  %v5574_v9 = vrot.slane %v1895_v60, %v5526_v20  ;;  %v5583_v27 = vrot.slane %v1996_v56, %v5515_v63  ;;  %v5586_v23 = vrot.slane %v2000_v62, %v5515_v63 }
 0x1b5   : > { %2677 = vperm.xlu1 %4590, %v2663_v33   ;;  %v1988_v33 = vrot.slane %v446_v2, %v5515_v63  ;;  %6893 = vst [vmem:[#allocation31_spill] sm:$0xff] %v5580_v30  ;;  %v5602_v30 = vmul.f32 %v2314_v34, %v5419_v51  ;;  %v5605_v56 = vrot.slane %v1899_v6, %v5526_v20 }
 0x1b6   : > { %v5595_v60 = vrot.slane %v1887_v58, %v5526_v20  ;;  %v5611_v62 = vmul.f32 %v5302_v52, %v5377_v40  ;;  %v5615_v58 = vmul.f32 %v5457_v24, %v5408_v48  ;;  %v5651_v34 = vmul.f32 %v5396_v53, %v5325_v8 }
 0x1b7   : > { %v5549_v55 = vrot.slane %v1988_v33, %v5515_v63  ;;  %6896 = vst [vmem:[#allocation34_spill] sm:$0xff] %v5602_v30  ;;  %v5619_v63 = vmul.f32 %v5457_v24, %v5422_v54  ;;  %v5628_v30 = vmul.f32 %v5483_v19, %v5445_v17 }
 0x1b8   : > { %6897 = vst [vmem:[#allocation35_spill] sm:$0xff] %v5611_v62  ;;  %6898 = vst [vmem:[#allocation36_spill] sm:$0xff] %v5615_v58  ;;  %v5643_v58 = vmul.f32 %v5302_v52, %v5394_v49 }
 0x1b9   : > { %6899 = vst [vmem:[#allocation37_spill] sm:$0xff] %v5619_v63  ;;  %6901 = vst [vmem:[#allocation39_spill] sm:$0xff] %v5628_v30  ;;  %v2090_v63 = vmul.f32 %v5396_v53, %v5334_v15  ;;  %v5647_v30 = vmul.f32 %v5440_v11, %v5325_v8  ;;  %v5659_v15 = vmul.f32 %v5396_v53, %v5350_v22 }
 0x1ba   : > { %6904 = vst [vmem:[#allocation42_spill] sm:$0xff] %v5643_v58  ;;  %v5667_v58 = vmul.f32 %v5414_v4, %v5405_v61  ;;  %v5676_v22 = vmul.f32 %v5302_v52, %v5363_v31  ;;  %v5680_v53 = vmul.f32 %v5384_v32, %v5363_v31  ;;  %v5699_v31 = vmul.f32 %v5384_v32, %v5394_v49 }
 0x1bb   : > { %v5721_v49 = vmul.f32 %v5483_v19, %v5448_v18 }
 0x1bc   : > { %6906 = vst [vmem:[#allocation44_spill] sm:$0xff] %v5667_v58  ;;  %v5685_v58 = vmul.f32 %v5302_v52, %v5387_v38  ;;  %6909 = vst [vmem:[#allocation47_spill] sm:$0xff] %v5699_v31  ;;  %v5707_v52 = vmul.f32 %v5414_v4, %v5422_v54  ;;  %v5729_v54 = vmul.f32 %v5457_v24, %v5405_v61 }
 0x1bd   : > { %6912 = vst [vmem:[#allocation50_spill] sm:$0xff] %v5721_v49 }
 0x1be   : > { %6911 = vst [vmem:[#allocation49_spill] sm:$0xff] %v5707_v52  ;;  %6913 = vst [vmem:[#allocation51_spill] sm:$0xff] %v5729_v54 }
 0x1df   : > { %v5537_v50 = vpop.permute.xlu0 %1936  ;;  %v1832_v28 = vpop.permute.xlu1 %1831 }
 0x1e3   : > { %v5568_v33 = vpop.permute.xlu0 %1952  ;;  %v1848_v2 = vpop.permute.xlu1 %1847 }
 0x1e7   : > { %v1945_v6 = vpop.permute.xlu0 %1944  ;;  %v1840_v20 = vpop.permute.xlu1 %1839 }
 0x1e8   : > { %v1874_v29 = vsel %vm1865_vm1, %v1832_v28, %v1840_v20  ;;  %v1977_v8 = vsel %vm1968_vm2, %v5537_v50, %v1945_v6  ;;  %v1870_v11 = vsel %vm1865_vm1, %v1840_v20, %v1848_v2  ;;  %v5693_v20 = vmul.f32 %v5384_v32, %v5377_v40 }
 0x1e9   : > { %v1921_v44 = vmul.f32 %v5571_v0, %v1874_v29  ;;  %v5703_v29 = vmul.f32 %v5414_v4, %v5408_v48  ;;  %v1973_v40 = vsel %vm1968_vm2, %v1945_v6, %v5568_v33  ;;  %v5713_v38 = vmul.f32 %v5549_v55, %v1977_v8 }
 0x1ea   : > { %6908 = vst [vmem:[#allocation46_spill] sm:$0xff] %v5693_v20  ;;  %v5733_v6 = vmul.f32 %v5457_v24, %v5419_v51  ;;  %v5741_v8 = vmul.f32 %v5509_v41, %v5448_v18  ;;  %v2022_v54 = vmul.f32 %v5559_v5, %v1973_v40  ;;  %v5773_v20 = vmul.f32 %v5428_v7, %v5448_v18 }
 0x1eb   : > { %v1961_v62 = vpop.permute.xlu0 %1960  ;;  %v1856_v46 = vpop.permute.xlu1 %1855  ;;  %6910 = vst [vmem:[#allocation48_spill] sm:$0xff] %v5703_v29  ;;  %v2433_v51 = vmul.f32 %v5347_v16, %v1921_v44 }
 0x1ec   : > { %v1878_v26 = vsel %vm1865_vm1, %v1856_v46, %v1832_v28  ;;  %v1922_v28 = vmul.f32 %v5574_v9, %v1870_v11  ;;  %6914 = vst [vmem:[#allocation52_spill] sm:$0xff] %v5733_v6  ;;  %6916 = vst [vmem:[#allocation54_spill] sm:$0xff] %v5741_v8  ;;  %v2058_v11 = vmul.f32 %v5513_v59, %v1921_v44 }
 0x1ed   : > { %v5717_v32 = vmul.f32 %v5595_v60, %v1878_v26  ;;  %v5737_v26 = vmul.f32 %v5428_v7, %v5445_v17  ;;  %v1866_v49 = vsel %vm1865_vm1, %v1848_v2, %v1856_v46  ;;  %v1969_v17 = vsel %vm1968_vm2, %v5568_v33, %v1961_v62 }
 0x1ee   : > { %v2289_v8 = vmul.f32 %v5495_v37, %v1921_v44  ;;  %v2137_v46 = vmul.f32 %v5327_v10, %v5713_v38  ;;  %v1981_v2 = vsel %vm1968_vm2, %v1961_v62, %v5537_v50  ;;  %v1923_v40 = vmul.f32 %v5605_v56, %v1866_v49 }
 0x1ef   : > { %v5723_v48 = vpop.permute.xlu0 %1833  ;;  %v5725_v4 = vpop.permute.xlu1 %1938  ;;  %6915 = vst [vmem:[#allocation53_spill] sm:$0xff] %v5737_v26  ;;  %v2057_v61 = vmul.f32 %v5513_v59, %v5717_v32  ;;  %v2432_v24 = vmul.f32 %v5347_v16, %v5717_v32  ;;  %v2290_v26 = vmul.f32 %v5495_v37, %v1922_v28  ;;  %v2512_v44 = vmul.f32 %v5442_v14, %v5713_v38 }
 0x1f0   : > { %v2106_v31 = vadd.f32 %v2090_v63, %v2058_v11  ;;  %v5777_v50 = vmul.f32 %v5509_v41, %v5455_v21  ;;  %v2434_v62 = vmul.f32 %v5347_v16, %v1922_v28  ;;  %v2481_v25 = vadd.f32 %v2465_v1, %v2433_v51 }
 0x1f1   : > { %v2105_v6 = vadd.f32 %v2089_v43, %v2057_v61  ;;  %v2480_v29 = vadd.f32 %v5599_v3, %v2432_v24  ;;  %v2023_v43 = vmul.f32 %v5583_v27, %v1969_v17  ;;  %v2369_v3 = vmul.f32 %v5505_v47, %v2022_v54 }
 0x1f2   : > { %6917 = vst [vmem:[#allocation55_spill] sm:$0xff] %v5777_v50  ;;  %v2059_v24 = vmul.f32 %v5513_v59, %v1922_v28  ;;  %v2024_v17 = vmul.f32 %v5586_v23, %v1981_v2  ;;  %v2138_v18 = vmul.f32 %v5327_v10, %v2022_v54  ;;  %v2435_v63 = vmul.f32 %v5347_v16, %v1923_v40 }
 0x1f3   : > { %v5763_v52 = vpop.permute.xlu0 %1849  ;;  %v5765_v33 = vpop.permute.xlu1 %1954  ;;  %v2153_v61 = vadd.f32 %v2137_v46, %v2105_v6  ;;  %v2528_v49 = vadd.f32 %v2512_v44, %v2480_v29  ;;  %v2513_v1 = vmul.f32 %v5442_v14, %v2022_v54  ;;  %v2337_v29 = vadd.f32 %v5553_v35, %v2289_v8 }
 0x1f4   : > { %v5790_v28 = vadd.f32 %v5556_v57, %v2290_v26  ;;  %v2060_v51 = vmul.f32 %v5513_v59, %v1923_v40  ;;  %v2154_v46 = vadd.f32 %v2138_v18, %v2106_v31  ;;  %v2514_v2 = vmul.f32 %v5442_v14, %v2023_v43 }
 0x1f5   : > { %2169 = vrot.lane.b32.xlu0 %v2153_v61, %s4839_s30  ;;  %2544 = vrot.lane.b32.xlu1 %v2528_v49, %s4840_s15  ;;  %v2139_v44 = vmul.f32 %v5327_v10, %v2023_v43  ;;  %v2529_v16 = vadd.f32 %v2513_v1, %v2481_v25  ;;  %v2482_v61 = vadd.f32 %v5647_v30, %v2434_v62 }
 0x1f6   : > { %v5798_v49 = vmul.f32 %v5428_v7, %v5455_v21  ;;  %v5802_v35 = vmul.f32 %v5483_v19, %v5455_v21  ;;  %v2107_v25 = vadd.f32 %v5651_v34, %v2059_v24  ;;  %v5812_v30 = vadd.f32 %v2369_v3, %v2337_v29 }
 0x1f7   : > { %v1842_v6 = vpop.permute.xlu0 %1841  ;;  %v1947_v11 = vpop.permute.xlu1 %1946  ;;  %v5816_v31 = vmul.f32 %v5509_v41, %v5466_v13  ;;  %v5820_v21 = vmul.f32 %v5505_v47, %v5713_v38  ;;  %v2483_v8 = vadd.f32 %v5655_v39, %v2435_v63  ;;  %v5826_v62 = vmul.f32 %v5428_v7, %v5466_v13 }
 0x1f8   : > { %v1871_v57 = vsel %vm1865_vm1, %v1842_v6, %v5763_v52  ;;  %v1875_v59 = vsel %vm1865_vm1, %v5723_v48, %v1842_v6  ;;  %6918 = vst [vmem:[#allocation56_spill] sm:$0xff] %v5812_v30  ;;  %v2530_v34 = vadd.f32 %v2514_v2, %v2482_v61  ;;  %v2155_v3 = vadd.f32 %v2139_v44, %v2107_v25 }
 0x1f9   : > { %2177 = vrot.lane.b32.xlu0 %v2154_v46, %s4839_s30  ;;  %6919 = vst [vmem:[#allocation57_spill] sm:$0xff] %v5816_v31  ;;  %2552 = vrot.lane.b32.xlu1 %v2529_v16, %s4840_s15  ;;  %v2515_v24 = vmul.f32 %v5442_v14, %v2024_v17  ;;  %v2108_v41 = vadd.f32 %v5659_v15, %v2060_v51 }
 0x1fa   : > { %v1925_v18 = vmul.f32 %v5571_v0, %v1875_v59  ;;  %v1926_v38 = vmul.f32 %v5574_v9, %v1871_v57  ;;  %v1978_v6 = vsel %vm1968_vm2, %v5725_v4, %v1947_v11  ;;  %v5839_v7 = vmul.f32 %v5505_v47, %v2023_v43 }
 0x1fb   : > { %v1858_v54 = vpop.permute.xlu0 %1857  ;;  %v1963_v26 = vpop.permute.xlu1 %1962  ;;  %v1974_v14 = vsel %vm1968_vm2, %v1947_v11, %v5765_v33  ;;  %v2140_v63 = vmul.f32 %v5327_v10, %v2024_v17  ;;  %v5848_v1 = vmul.f32 %v5505_v47, %v2024_v17  ;;  %v5852_v29 = vmul.f32 %v5495_v37, %v5717_v32 }
 0x1fc   : > { %v1879_v39 = vsel %vm1865_vm1, %v1858_v54, %v5723_v48  ;;  %v5855_v48 = vmul.f32 %v5495_v37, %v1923_v40  ;;  %v2531_v51 = vadd.f32 %v2515_v24, %v2483_v8  ;;  %v2025_v46 = vmul.f32 %v5549_v55, %v1978_v6  ;;  %v6920_v24 = vld [vmem:[#allocation11_spill] sm:$0xff]  ;;  %v6921_v6 = vld [vmem:[#allocation9_spill] sm:$0xff] }
 0x1fd   : > { %v1924_v15 = vmul.f32 %v5595_v60, %v1879_v39  ;;  %2185 = vrot.lane.b32.xlu0 %v2155_v3, %s4839_s30  ;;  %2560 = vrot.lane.b32.xlu1 %v2530_v34, %s4840_s15  ;;  %v1867_v10 = vsel %vm1865_vm1, %v5763_v52, %v1858_v54  ;;  %v2156_v17 = vadd.f32 %v2140_v63, %v2108_v41 }
 0x1fe   : > { %v2062_v32 = vmul.f32 %v5295_v45, %v1925_v18  ;;  %v2063_v2 = vmul.f32 %v5295_v45, %v1926_v38  ;;  %v2026_v37 = vmul.f32 %v5559_v5, %v1974_v14  ;;  %v5868_v44 = vmul.f32 %v5499_v42, %v1925_v18  ;;  %v6922_v14 = vld [vmem:[#allocation18_spill] sm:$0xff] }
 0x1ff   : > { %v1836_v43 = vpop.permute.xlu0 %1835  ;;  %v1844_v11 = vpop.permute.xlu1 %1843  ;;  %v2061_v47 = vmul.f32 %v5295_v45, %v1924_v15  ;;  %v2436_v40 = vmul.f32 %v5365_v36, %v1924_v15  ;;  %v5871_v16 = vmul.f32 %v5499_v42, %v1926_v38  ;;  %v1970_v52 = vsel %vm1968_vm2, %v5765_v33, %v1963_v26 }
 0x200   : > { %v1876_v61 = vsel %vm1865_vm1, %v1836_v43, %v1844_v11  ;;  %v1927_v57 = vmul.f32 %v5605_v56, %v1867_v10  ;;  %v1982_v59 = vsel %vm1968_vm2, %v1963_v26, %v5725_v4  ;;  %v2437_v33 = vmul.f32 %v5365_v36, %v1925_v18  ;;  %v6923_v10 = vld [vmem:[#allocation35_spill] sm:$0xff] }
 0x201   : > { %2193 = vrot.lane.b32.xlu0 %v2156_v17, %s4839_s30  ;;  %2568 = vrot.lane.b32.xlu1 %v2531_v51, %s4840_s15  ;;  %v2109_v8 = vadd.f32 %v5676_v22, %v2061_v47  ;;  %v2484_v34 = vadd.f32 %v5680_v53, %v2436_v40  ;;  %v2438_v3 = vmul.f32 %v5365_v36, %v1926_v38 }
 0x202   : > { %v2141_v41 = vmul.f32 %v6920_v24, %v2025_v46  ;;  %v2516_v39 = vmul.f32 %v6921_v6, %v2025_v46  ;;  %v5891_v63 = vmul.f32 %v6922_v14, %v2025_v46  ;;  %v5894_v4 = vmul.f32 %v6922_v14, %v2026_v37 }
 0x203   : > { %v1852_v25 = vpop.permute.xlu0 %1851  ;;  %v1860_v54 = vpop.permute.xlu1 %1859  ;;  %v2027_v26 = vmul.f32 %v5583_v27, %v1970_v52  ;;  %v1929_v22 = vmul.f32 %v5571_v0, %v1876_v61  ;;  %v5899_v53 = vmul.f32 %v5586_v23, %v1982_v59  ;;  %v2110_v38 = vadd.f32 %v5685_v58, %v2062_v32  ;;  %v6924_v32 = vld [vmem:[#allocation45_spill] sm:$0xff] }
 0x204   : > { %v2157_v18 = vadd.f32 %v2141_v41, %v2109_v8  ;;  %v2532_v51 = vadd.f32 %v2516_v39, %v2484_v34  ;;  %v2111_v47 = vadd.f32 %v6923_v10, %v2063_v2  ;;  %v2064_v17 = vmul.f32 %v5295_v45, %v1927_v57  ;;  %v6925_v8 = vld [vmem:[#allocation8_spill] sm:$0xff] }
 0x205   : > { %v5905_v46 = vmul.f32 %v5499_v42, %v1924_v15  ;;  %v1872_v40 = vsel %vm1865_vm1, %v1844_v11, %v1852_v25  ;;  %v1868_v61 = vsel %vm1865_vm1, %v1852_v25, %v1860_v54  ;;  %v1880_v59 = vsel %vm1865_vm1, %v1860_v54, %v1836_v43 }
 0x206   : > { %2171 = vrot.lane.b32.xlu1 %v2157_v18, %s4839_s30  ;;  %v2142_v58 = vmul.f32 %v6920_v24, %v2026_v37  ;;  %v2485_v45 = vadd.f32 %v6924_v32, %v2437_v33  ;;  %v5917_v15 = vmul.f32 %v5499_v42, %v1927_v57  ;;  %v2439_v2 = vmul.f32 %v5365_v36, %v1927_v57  ;;  %v6926_v33 = vld [vmem:[#allocation42_spill] sm:$0xff] }
 0x207   : > { %v1941_v52 = vpop.permute.xlu0 %1940  ;;  %v1949_v30 = vpop.permute.xlu1 %1948  ;;  %v2143_v11 = vmul.f32 %v6920_v24, %v2027_v26  ;;  %v2441_v34 = vmul.f32 %v6925_v8, %v1929_v22  ;;  %2546 = vrot.lane.b32.xlu0 %v2532_v51, %s4840_s15  ;;  %v2144_v43 = vmul.f32 %v6920_v24, %v5899_v53  ;;  %v1930_v25 = vmul.f32 %v5574_v9, %v1872_v40 }
 0x208   : > { %v2158_v54 = vadd.f32 %v2142_v58, %v2110_v38  ;;  %v2517_v41 = vmul.f32 %v6921_v6, %v2026_v37  ;;  %v2112_v39 = vadd.f32 %v6926_v33, %v2064_v17  ;;  %v1928_v42 = vmul.f32 %v5595_v60, %v1880_v59  ;;  %v6928_v17 = vld [vmem:[#allocation5_spill] sm:$0xff]  ;;  %v6930_v58 = vld [vmem:[#allocation36_spill] sm:$0xff] }
 0x209   : > { %v1931_v36 = vmul.f32 %v5605_v56, %v1868_v61  ;;  %v1979_v57 = vsel %vm1968_vm2, %v1941_v52, %v1949_v30  ;;  %v5933_v51 = vmul.f32 %v6922_v14, %v2027_v26  ;;  %v5937_v24 = vmul.f32 %v6922_v14, %v5899_v53  ;;  %v6929_v61 = vld [vmem:[#allocation17_spill] sm:$0xff] }
 0x20a   : > { %2179 = vrot.lane.b32.xlu1 %v2158_v54, %s4839_s30  ;;  %v2533_v37 = vadd.f32 %v2517_v41, %v2485_v45  ;;  %v2518_v38 = vmul.f32 %v6921_v6, %v2027_v26  ;;  %v2066_v40 = vmul.f32 %v6928_v17, %v1929_v22  ;;  %v5943_v59 = vmul.f32 %v6929_v61, %v1929_v22  ;;  %v6931_v26 = vld [vmem:[#allocation46_spill] sm:$0xff] }
 0x20b   : > { %v1957_v18 = vpop.permute.xlu0 %1956  ;;  %v1965_v10 = vpop.permute.xlu1 %1964  ;;  %6927 = vst [vmem:[#allocation11_spill] sm:$0xff] %v5937_v24  ;;  %v5946_v32 = vadd.f32 %v6930_v58, %v2441_v34  ;;  %v2067_v19 = vmul.f32 %v6928_v17, %v1930_v25  ;;  %v5952_v14 = vmul.f32 %v5549_v55, %v1979_v57  ;;  %v2159_v45 = vadd.f32 %v2143_v11, %v2111_v47  ;;  %v6932_v11 = vld [vmem:[#allocation47_spill] sm:$0xff] }
 0x20c   : > { %v1975_v33 = vsel %vm1968_vm2, %v1949_v30, %v1957_v18  ;;  %2554 = vrot.lane.b32.xlu0 %v2533_v37, %s4840_s15  ;;  %v2486_v54 = vadd.f32 %v6931_v26, %v2438_v3  ;;  %v5957_v41 = vmul.f32 %v6929_v61, %v1930_v25  ;;  %v2065_v22 = vmul.f32 %v6928_v17, %v1928_v42 }
 0x20d   : > { %v2443_v34 = vmul.f32 %v6925_v8, %v1931_v36  ;;  %v1971_v30 = vsel %vm1968_vm2, %v1957_v18, %v1965_v10  ;;  %v2030_v57 = vmul.f32 %v5559_v5, %v1975_v33  ;;  %v1983_v47 = vsel %vm1968_vm2, %v1965_v10, %v1941_v52  ;;  %v6935_v33 = vld [vmem:[#allocation7_spill] sm:$0xff] }
 0x20e   : > { %2187 = vrot.lane.b32.xlu1 %v2159_v45, %s4839_s30  ;;  %v2534_v3 = vadd.f32 %v2518_v38, %v2486_v54  ;;  %v2487_v37 = vadd.f32 %v6932_v11, %v2439_v2  ;;  %v2442_v26 = vmul.f32 %v6925_v8, %v1930_v25  ;;  %v2068_v31 = vmul.f32 %v6928_v17, %v1931_v36  ;;  %v6936_v25 = vld [vmem:[#allocation43_spill] sm:$0xff]  ;;  %v6937_v17 = vld [vmem:[#allocation44_spill] sm:$0xff] }
 0x20f   : > { %v5963_v58 = vpop.permute.xlu0 %1853  ;;  %v5965_v13 = vpop.permute.xlu1 %1837  ;;  %v5975_v18 = vmul.f32 %v6929_v61, %v1928_v42  ;;  %v5978_v50 = vmul.f32 %v6929_v61, %v1931_v36  ;;  %v2145_v24 = vmul.f32 %v6935_v33, %v5952_v14  ;;  %v2031_v52 = vmul.f32 %v5583_v27, %v1971_v30 }
 0x210   : > { %2562 = vrot.lane.b32.xlu0 %v2534_v3, %s4840_s15  ;;  %v2160_v10 = vadd.f32 %v2144_v43, %v2112_v39  ;;  %v2519_v2 = vmul.f32 %v6921_v6, %v5899_v53  ;;  %v2115_v38 = vadd.f32 %v6936_v25, %v2067_v19  ;;  %v2113_v45 = vadd.f32 %v6937_v17, %v2065_v22  ;;  %v6939_v19 = vld [vmem:[#allocation20_spill] sm:$0xff]  ;;  %v6942_v25 = vld [vmem:[#allocation23_spill] sm:$0xff] }
 0x211   : > { %6933 = vst [vmem:[#allocation9_spill] sm:$0xff] %v5975_v18  ;;  %6934 = vst [vmem:[#allocation18_spill] sm:$0xff] %v5978_v50  ;;  %v2440_v54 = vmul.f32 %v6925_v8, %v1928_v42  ;;  %v2032_v36 = vmul.f32 %v5586_v23, %v1983_v47  ;;  %v6938_v50 = vld [vmem:[#allocation37_spill] sm:$0xff]  ;;  %v2146_v6 = vmul.f32 %v6935_v33, %v2030_v57  ;;  %v6940_v42 = vld [vmem:[#allocation15_spill] sm:$0xff] }
 0x212   : > { %v2491_v18 = vadd.f32 %v6938_v50, %v2443_v34  ;;  %2195 = vrot.lane.b32.xlu1 %v2160_v10, %s4839_s30  ;;  %v2535_v30 = vadd.f32 %v2519_v2, %v2487_v37  ;;  %v5997_v53 = vmul.f32 %v6939_v19, %v5952_v14  ;;  %v6000_v8 = vmul.f32 %v6939_v19, %v2030_v57  ;;  %v6941_v3 = vld [vmem:[#allocation48_spill] sm:$0xff] }
 0x213   : > { %v1951_v61 = vpop.permute.xlu0 %1950  ;;  %v1943_v11 = vpop.permute.xlu1 %1942  ;;  %v6005_v50 = vadd.f32 %v5839_v7, %v5790_v28  ;;  %v2521_v22 = vmul.f32 %v6940_v42, %v2030_v57  ;;  %v2147_v34 = vmul.f32 %v6935_v33, %v2031_v52  ;;  %v2161_v47 = vadd.f32 %v2145_v24, %v2113_v45 }
 0x214   : > { %v1980_v43 = vsel %vm1968_vm2, %v1943_v11, %v1951_v61  ;;  %2570 = vrot.lane.b32.xlu0 %v2535_v30, %s4840_s15  ;;  %v2114_v37 = vadd.f32 %v6941_v3, %v2066_v40  ;;  %v6012_v10 = vmul.f32 %v6939_v19, %v2031_v52  ;;  %v2523_v2 = vmul.f32 %v6940_v42, %v2032_v36  ;;  %v6944_v3 = vld [vmem:[#allocation27_spill] sm:$0xff] }
 0x215   : > { %v2033_v39 = vmul.f32 %v5549_v55, %v1980_v43  ;;  %v2148_v7 = vmul.f32 %v6935_v33, %v2032_v36 }
 0x216   : > { %2173 = vrot.lane.b32.xlu1 %v2161_v47, %s4839_s30  ;;  %v2162_v57 = vadd.f32 %v2146_v6, %v2114_v37  ;;  %v6943_v47 = vld [vmem:[#allocation49_spill] sm:$0xff]  ;;  %v2336_v37 = vadd.f32 %v6944_v3, %v5852_v29  ;;  %v2522_v29 = vmul.f32 %v6940_v42, %v2031_v52  ;;  %v6947_v52 = vld [vmem:[#allocation51_spill] sm:$0xff] }
 0x217   : > { %v6016_v55 = vmul.f32 %v6942_v25, %v2033_v39  ;;  %v1967_v17 = vpop.permute.xlu0 %1966  ;;  %v1959_v28 = vpop.permute.xlu1 %1958  ;;  %v2116_v6 = vadd.f32 %v6943_v47, %v2068_v31 }
 0x218   : > { %v1984_v24 = vsel %vm1968_vm2, %v1967_v17, %v1943_v11  ;;  %v1972_v40 = vsel %vm1968_vm2, %v1959_v28, %v1967_v17  ;;  %v1976_v45 = vsel %vm1968_vm2, %v1951_v61, %v1959_v28  ;;  %2181 = vrot.lane.b32.xlu0 %v2162_v57, %s4839_s30  ;;  %v2163_v11 = vadd.f32 %v2147_v34, %v2115_v38  ;;  %v6945_v17 = vld [vmem:[#allocation28_spill] sm:$0xff] }
 0x219   : > { %v6027_v30 = vmul.f32 %v5586_v23, %v1984_v24  ;;  %v6030_v43 = vmul.f32 %v5559_v5, %v1976_v45  ;;  %v6033_v33 = vmul.f32 %v5583_v27, %v1972_v40  ;;  %v2339_v61 = vadd.f32 %v6945_v17, %v5855_v48  ;;  %v6946_v23 = vld [vmem:[#allocation30_spill] sm:$0xff]  ;;  %v6948_v40 = vld [vmem:[#allocation52_spill] sm:$0xff] }
 0x21a   : > { %v2341_v28 = vadd.f32 %v6946_v23, %v5868_v44  ;;  %v2520_v38 = vmul.f32 %v6940_v42, %v5952_v14  ;;  %2189 = vrot.lane.b32.xlu1 %v2163_v11, %s4839_s30  ;;  %v2164_v44 = vadd.f32 %v2148_v7, %v2116_v6  ;;  %v2488_v42 = vadd.f32 %v6947_v52, %v2440_v54  ;;  %v6949_v11 = vld [vmem:[#allocation6_spill] sm:$0xff]  ;;  %v6950_v23 = vld [vmem:[#allocation16_spill] sm:$0xff]  ;;  %v6955_v52 = vld [vmem:[#allocation53_spill] sm:$0xff] }
 0x21b   : > { %v6045_v5 = vmul.f32 %v6942_v25, %v6027_v30  ;;  %v6049_v27 = vmul.f32 %v6942_v25, %v6030_v43  ;;  %v1846_v31 = vpop.permute.xlu1 %1845  ;;  %v6056_v48 = vmul.f32 %v6942_v25, %v6033_v33  ;;  %v2490_v25 = vadd.f32 %v6948_v40, %v2442_v26 }
 0x21c   : > { %v1873_v34 = vsel %vm1865_vm1, %v1846_v31, %v5963_v58  ;;  %v1877_v57 = vsel %vm1865_vm1, %v5965_v13, %v1846_v31  ;;  %v2379_v45 = vmul.f32 %v6939_v19, %v2032_v36  ;;  %2197 = vrot.lane.b32.xlu0 %v2164_v44, %s4839_s30  ;;  %v2537_v7 = vadd.f32 %v2521_v22, %v5946_v32 }
 0x21d   : > { %v1933_v24 = vmul.f32 %v5571_v0, %v1877_v57  ;;  %v1934_v14 = vmul.f32 %v5574_v9, %v1873_v34  ;;  %v6073_v47 = vadd.f32 %v5820_v21, %v2336_v37  ;;  %v6076_v6 = vadd.f32 %v5848_v1, %v2339_v61  ;;  %v6951_v1 = vld [vmem:[#allocation13_spill] sm:$0xff]  ;;  %v6952_v61 = vld [vmem:[#allocation12_spill] sm:$0xff] }
 0x21e   : > { %v2536_v3 = vadd.f32 %v2520_v38, %v2488_v42  ;;  %v2539_v17 = vadd.f32 %v2523_v2, %v2491_v18  ;;  %v2538_v54 = vadd.f32 %v2522_v29, %v2490_v25  ;;  %v2524_v26 = vmul.f32 %v6950_v23, %v2033_v39  ;;  %2556 = vrot.lane.b32.xlu1 %v2537_v7, %s4840_s15  ;;  %v6954_v29 = vld [vmem:[#allocation19_spill] sm:$0xff] }
 0x21f   : > { %v2070_v0 = vmul.f32 %v6949_v11, %v1933_v24  ;;  %v1862_v9 = vpop.permute.xlu1 %1861  ;;  %v2149_v36 = vmul.f32 %v6951_v1, %v2033_v39  ;;  %v2071_v19 = vmul.f32 %v6949_v11, %v1934_v14  ;;  %v2150_v37 = vmul.f32 %v6951_v1, %v6030_v43 }
 0x220   : > { %v1869_v32 = vsel %vm1865_vm1, %v5963_v58, %v1862_v9  ;;  %v1881_v21 = vsel %vm1865_vm1, %v1862_v9, %v5965_v13  ;;  %v2445_v31 = vmul.f32 %v6952_v61, %v1933_v24  ;;  %2548 = vrot.lane.b32.xlu0 %v2536_v3, %s4840_s15  ;;  %v6097_v58 = vadd.f32 %v5894_v4, %v2341_v28  ;;  %v6953_v13 = vld [vmem:[#allocation31_spill] sm:$0xff] }
 0x221   : > { %v2118_v22 = vadd.f32 %v5798_v49, %v2070_v0  ;;  %v1932_v18 = vmul.f32 %v5595_v60, %v1881_v21  ;;  %v1935_v2 = vmul.f32 %v5605_v56, %v1869_v32  ;;  %v2342_v39 = vadd.f32 %v6953_v13, %v5871_v16  ;;  %v6959_v32 = vld [vmem:[#allocation39_spill] sm:$0xff]  ;;  %v6966_v13 = vld [vmem:[#allocation41_spill] sm:$0xff] }
 0x222   : > { %v2152_v49 = vmul.f32 %v6951_v1, %v6027_v30  ;;  %v2151_v38 = vmul.f32 %v6951_v1, %v6033_v33  ;;  %v2301_v44 = vmul.f32 %v6954_v29, %v1933_v24  ;;  %v2302_v34 = vmul.f32 %v6954_v29, %v1934_v14  ;;  %2572 = vrot.lane.b32.xlu1 %v2539_v17, %s4840_s15  ;;  %v6961_v1 = vld [vmem:[#allocation11_spill] sm:$0xff] }
 0x223   : > { %v2069_v60 = vmul.f32 %v6949_v11, %v1932_v18  ;;  %v2072_v56 = vmul.f32 %v6949_v11, %v1935_v2  ;;  %v2444_v4 = vmul.f32 %v6952_v61, %v1932_v18  ;;  %v2166_v28 = vadd.f32 %v2150_v37, %v2118_v22  ;;  %v6956_v11 = vld [vmem:[#allocation29_spill] sm:$0xff]  ;;  %v6965_v37 = vld [vmem:[#allocation40_spill] sm:$0xff] }
 0x224   : > { %v2446_v16 = vmul.f32 %v6952_v61, %v1934_v14  ;;  %v2119_v40 = vadd.f32 %v5773_v20, %v2071_v19  ;;  %v2300_v25 = vmul.f32 %v6954_v29, %v1932_v18  ;;  %2564 = vrot.lane.b32.xlu0 %v2538_v54, %s4840_s15  ;;  %v2493_v24 = vadd.f32 %v5802_v35, %v2445_v31  ;;  %v6958_v20 = vld [vmem:[#allocation38_spill] sm:$0xff]  ;;  %v6963_v22 = vld [vmem:[#allocation33_spill] sm:$0xff] }
 0x225   : > { %v2120_v57 = vadd.f32 %v5826_v62, %v2072_v56  ;;  %v2117_v42 = vadd.f32 %v6955_v52, %v2069_v60  ;;  %v6119_v7 = vadd.f32 %v5933_v51, %v2342_v39  ;;  %v2340_v0 = vadd.f32 %v6956_v11, %v5905_v46  ;;  %v6957_v62 = vld [vmem:[#allocation32_spill] sm:$0xff]  ;;  %v6960_v54 = vld [vmem:[#allocation34_spill] sm:$0xff] }
 0x226   : > { %v2303_v14 = vmul.f32 %v6954_v29, %v1935_v2  ;;  %v2343_v9 = vadd.f32 %v6957_v62, %v5917_v15  ;;  %v2345_v17 = vadd.f32 %v6958_v20, %v5943_v59  ;;  %v2492_v21 = vadd.f32 %v6959_v32, %v2444_v4  ;;  %2183 = vrot.lane.b32.xlu1 %v2166_v28, %s4839_s30  ;;  %v6962_v15 = vld [vmem:[#allocation9_spill] sm:$0xff]  ;;  %v6964_v18 = vld [vmem:[#allocation18_spill] sm:$0xff] }
 0x227   : > { %v2165_v3 = vadd.f32 %v2149_v36, %v2117_v42  ;;  %v2168_v35 = vadd.f32 %v2152_v49, %v2120_v57  ;;  %v6131_v51 = vadd.f32 %v5891_v63, %v2340_v0  ;;  %v2346_v46 = vadd.f32 %v6960_v54, %v5957_v41  ;;  %v6967_v41 = vld [vmem:[#allocation55_spill] sm:$0xff]  ;;  %v6968_v60 = vld [vmem:[#allocation54_spill] sm:$0xff]  ;;  %v6969_v28 = vld [vmem:[#allocation57_spill] sm:$0xff] }
 0x228   : > { %v6136_v19 = vadd.f32 %v6961_v1, %v2343_v9  ;;  %v6139_v36 = vadd.f32 %v6000_v8, %v2345_v17  ;;  %v2344_v59 = vadd.f32 %v6963_v22, %v6962_v15  ;;  %v2347_v31 = vadd.f32 %v6965_v37, %v6964_v18  ;;  %v6191_v11 = vpop.permute.xlu0 %2682  ;;  %v6973_v0 = vld [vmem:[#allocation26_spill] sm:$0xff]  ;;  %v6974_v62 = vld [vmem:[#allocation25_spill] sm:$0xff] }
 0x229   : > { %2175 = vrot.lane.b32.xlu0 %v2165_v3, %s4839_s30  ;;  %v6147_v63 = vadd.f32 %v6012_v10, %v2346_v46  ;;  %v2348_v39 = vadd.f32 %v6966_v13, %v2300_v25  ;;  %v2349_v49 = vadd.f32 %v6967_v41, %v2301_v44  ;;  %v2350_v56 = vadd.f32 %v6968_v60, %v2302_v34  ;;  %v6971_v34 = vld [vmem:[#allocation10_spill] sm:$0xff]  ;;  %v6977_v13 = vld [vmem:[#allocation56_spill] sm:$0xff] }
 0x22a   : > { %v2447_v8 = vmul.f32 %v6952_v61, %v1935_v2  ;;  %v6154_v29 = vadd.f32 %v5997_v53, %v2344_v59  ;;  %v6156_v4 = vadd.f32 %v2379_v45, %v2347_v31  ;;  %v2351_v57 = vadd.f32 %v6969_v28, %v2303_v14  ;;  %2199 = vrot.lane.b32.xlu1 %v2168_v35, %s4839_s30  ;;  %v6970_v53 = vld [vmem:[#allocation50_spill] sm:$0xff]  ;;  %v6976_v59 = vld [vmem:[#allocation21_spill] sm:$0xff] }
 0x22b   : > { %v2167_v52 = vadd.f32 %v2151_v38, %v2119_v40  ;;  %v6161_v10 = vadd.f32 %v6016_v55, %v2348_v39  ;;  %v6164_v42 = vadd.f32 %v6049_v27, %v2349_v49  ;;  %v6167_v44 = vadd.f32 %v6056_v48, %v2350_v56  ;;  %v6972_v55 = vld [vmem:[#allocation14_spill] sm:$0xff] }
 0x22c   : > { %v6170_v2 = vadd.f32 %v6045_v5, %v2351_v57  ;;  %v2494_v45 = vadd.f32 %v6970_v53, %v2446_v16  ;;  %v2540_v61 = vadd.f32 %v2524_v26, %v2492_v21  ;;  %v2525_v38 = vmul.f32 %v6950_v23, %v6030_v43  ;;  %v6975_v17 = vld [vmem:[#allocation22_spill] sm:$0xff] }
 0x22d   : > { %2191 = vrot.lane.b32.xlu0 %v2167_v52, %s4839_s30  ;;  %v2479_v40 = vmul.f32 %v6972_v55, %v6971_v34  ;;  %v2526_v27 = vmul.f32 %v6950_v23, %v6033_v33  ;;  %v2527_v26 = vmul.f32 %v6950_v23, %v6027_v30  ;;  %v448_v33 = vld [vmem:[%s6815_s2] sm:$0x77]  ;;  %v449_v30 = vld [vmem:[%s6815_s2 + $0x8] sm:$0x77]  ;;  %s4181_s30 = sshll.u32 %s434_s23, 4  ;;  %s6773_s30 = int_to_ptr.vmem [resolvable:$true] %s4181_s30 }
 0x22e   : > { %2550 = vrot.lane.b32.xlu1 %v2540_v61, %s4840_s15  ;;  %v2541_v48 = vadd.f32 %v2525_v38, %v2493_v24  ;;  %v2227_v14 = vrot.slane %v448_v33, %v6973_v0  ;;  %v2231_v20 = vrot.slane %v449_v30, %v6974_v62  ;;  %v2600_v32 = vrot.slane %v448_v33, %v6975_v17  ;;  %s4763_s16 = scalar_lea.vmem %s6773_s30, 512 }
 0x22f   : > { %v2495_v25 = vadd.f32 %v2479_v40, %v2447_v8  ;;  %v2542_v5 = vadd.f32 %v2526_v27, %v2494_v45  ;;  %v2223_v15 = vrot.slane %v448_v33, %v6974_v62  ;;  %v2235_v22 = vrot.slane %v449_v30, %v6973_v0  ;;  %v6978_v0 = vld [vmem:[#allocation24_spill] sm:$0xff]  ;;  %p4764_p11 = scmp.ne.s32.totalorder %s6773_s30, %s4763_s16 }
 0x230   : > { %v6186_v43 = vpop.permute.xlu1 %2672  ;;  %v6201_v9 = vrot.slane %v2227_v14, %v6974_v62  ;;  %v6209_v1 = vrot.slane %v2231_v20, %v6974_v62  ;;  %v6214_v18 = vrot.slane %v2600_v32, %v6976_v59  ;;  %v2604_v37 = vrot.slane %v449_v30, %v6976_v59 }
 0x231   : > { %2558 = vrot.lane.b32.xlu0 %v2541_v48, %s4840_s15  ;;  %v2543_v16 = vadd.f32 %v2527_v26, %v2495_v25  ;;  %v2596_v31 = vrot.slane %v448_v33, %v6976_v59  ;;  %v2608_v49 = vrot.slane %v449_v30, %v6975_v17  ;;  %v6227_v57 = vrot.slane %v2223_v15, %v6974_v62  ;;  %p4765_p12 = pnand %p4764_p11, %p4950_p5 }
 0x232   : > { %2566 = vrot.lane.b32.xlu1 %v2542_v5, %s4840_s15  ;;  %v6230_v52 = vrot.slane %v2235_v22, %v6974_v62  ;;  %v6234_v45 = vrot.slane %v2604_v37, %v6976_v59 }
 0x233   : > { %v6237_v61 = vrot.slane %v2596_v31, %v6976_v59  ;;  %v6241_v34 = vrot.slane %v2608_v49, %v6976_v59  ;;  %p4766_p13 = pneg %p4765_p12 }
 0x234   : > { %v6193_v24 = vpop.permute.xlu1 %2677 }
 0x235   : > { %2574 = vrot.lane.b32.xlu0 %v2543_v16, %s4840_s15 }
 0x267   : > { %v2170_v23 = vpop.permute.xlu0 %2169  ;;  %v2545_v3 = vpop.permute.xlu1 %2544 }
 0x26b   : > { %v2178_v21 = vpop.permute.xlu0 %2177  ;;  %v2553_v35 = vpop.permute.xlu1 %2552 }
 0x26c   : > { %v2210_v54 = vsel %vm2201_vm3, %v2170_v23, %v2178_v21  ;;  %v2585_v40 = vsel %vm2576_vm4, %v2545_v3, %v2553_v35 }
 0x26d   : > { %v2257_v46 = vmul.f32 %v6201_v9, %v2210_v54  ;;  %v2629_v20 = vmul.f32 %v6237_v61, %v2585_v40 }
 0x26f   : > { %v2401_v39 = vadd.f32 %v6977_v13, %v2257_v46  ;;  %v2186_v41 = vpop.permute.xlu0 %2185  ;;  %v2561_v60 = vpop.permute.xlu1 %2560 }
 0x270   : > { %v2206_v56 = vsel %vm2201_vm3, %v2178_v21, %v2186_v41  ;;  %v2581_v8 = vsel %vm2576_vm4, %v2553_v35, %v2561_v60 }
 0x271   : > { %v2258_v28 = vmul.f32 %v6209_v1, %v2206_v56  ;;  %v2630_v53 = vmul.f32 %v6214_v18, %v2581_v8 }
 0x273   : > { %v2402_v38 = vadd.f32 %v6005_v50, %v2258_v28  ;;  %v2194_v55 = vpop.permute.xlu0 %2193  ;;  %v2646_v27 = vadd.f32 %v2630_v53, %v2401_v39  ;;  %v2569_v48 = vpop.permute.xlu1 %2568 }
 0x274   : > { %v2202_v25 = vsel %vm2201_vm3, %v2186_v41, %v2194_v55  ;;  %v2214_v5 = vsel %vm2201_vm3, %v2194_v55, %v2170_v23  ;;  %v2577_v26 = vsel %vm2576_vm4, %v2561_v60, %v2569_v48  ;;  %v2589_v50 = vsel %vm2576_vm4, %v2569_v48, %v2545_v3 }
 0x275   : > { %v2256_v16 = vmul.f32 %v6227_v57, %v2214_v5  ;;  %v2259_v33 = vmul.f32 %v6230_v52, %v2202_v25  ;;  %v6256_v14 = vadd.f32 %v6978_v0, %v2646_v27  ;;  %v2631_v30 = vmul.f32 %v6234_v45, %v2577_v26 }
 0x276   : > { %v2632_v17 = vmul.f32 %v6241_v34, %v2589_v50 }
 0x277   : > { %v2400_v23 = vadd.f32 %v6073_v47, %v2256_v16  ;;  %v2403_v32 = vadd.f32 %v6076_v6, %v2259_v33  ;;  %v4264_v21 = vmul.f32 -1.442695, %v6256_v14  ;;  %v2647_v3 = vadd.f32 %v2631_v30, %v2402_v38 }
 0x278   : > { %v2172_v46 = vpop.permute.xlu1 %2171 }
 0x279   : > { %v2645_v35 = vadd.f32 %v2629_v20, %v2400_v23  ;;  %v2648_v54 = vadd.f32 %v2632_v17, %v2403_v32  ;;  %4655 = vpow2.f32 %v4264_v21  ;;  %v6265_v15 = vadd.f32 %v6978_v0, %v2647_v3  ;;  %v2547_v22 = vpop.permute.xlu0 %2546 }
 0x27b   : > { %v6268_v59 = vadd.f32 %v6978_v0, %v2645_v35  ;;  %v6271_v37 = vadd.f32 %v6978_v0, %v2648_v54  ;;  %v4265_v47 = vmul.f32 -1.442695, %v6265_v15 }
 0x27c   : > { %v2180_v6 = vpop.permute.xlu1 %2179 }
 0x27d   : > { %v4263_v31 = vmul.f32 -1.442695, %v6268_v59  ;;  %v4266_v13 = vmul.f32 -1.442695, %v6271_v37  ;;  %4657 = vpow2.f32 %v4265_v47  ;;  %v2211_v39 = vsel %vm2201_vm3, %v2172_v46, %v2180_v6 }
 0x27e   : > { %v2261_v41 = vmul.f32 %v6201_v9, %v2211_v39  ;;  %v2555_v49 = vpop.permute.xlu0 %2554 }
 0x27f   : > { %4659 = vpow2.f32 %v4263_v31  ;;  %v2586_v40 = vsel %vm2576_vm4, %v2547_v22, %v2555_v49 }
 0x280   : > { %4661 = vpow2.f32 %v4266_v13  ;;  %v2405_v60 = vadd.f32 %v6097_v58, %v2261_v41  ;;  %v2188_v56 = vpop.permute.xlu1 %2187  ;;  %v2633_v20 = vmul.f32 %v6237_v61, %v2586_v40 }
 0x281   : > { %v2207_v8 = vsel %vm2201_vm3, %v2180_v6, %v2188_v56 }
 0x282   : > { %v2262_v28 = vmul.f32 %v6209_v1, %v2207_v8  ;;  %v2563_v53 = vpop.permute.xlu0 %2562 }
 0x283   : > { %v4656_v38 = vpop.eup %4655  ;;  %v2582_v55 = vsel %vm2576_vm4, %v2555_v49, %v2563_v53 }
 0x284   : > { %v2406_v27 = vadd.f32 %v6119_v7, %v2262_v28  ;;  %v2634_v48 = vmul.f32 %v6214_v18, %v2582_v55  ;;  %v2196_v25 = vpop.permute.xlu1 %2195  ;;  %v2750_v58 = vadd.f32 1.0, %v4656_v38 }
 0x285   : > { %v2203_v5 = vsel %vm2201_vm3, %v2188_v56, %v2196_v25  ;;  %v2215_v26 = vsel %vm2201_vm3, %v2196_v25, %v2172_v46 }
 0x286   : > { %v2650_v50 = vadd.f32 %v2634_v48, %v2405_v60  ;;  %v2260_v16 = vmul.f32 %v6227_v57, %v2215_v26  ;;  %v2263_v33 = vmul.f32 %v6230_v52, %v2203_v5  ;;  %v2571_v0 = vpop.permute.xlu0 %2570  ;;  %4663 = vrcp.f32 %v2750_v58 }
 0x287   : > { %v4658_v30 = vpop.eup %4657  ;;  %v2578_v7 = vsel %vm2576_vm4, %v2563_v53, %v2571_v0  ;;  %v2590_v17 = vsel %vm2576_vm4, %v2571_v0, %v2547_v22 }
 0x288   : > { %v2751_v32 = vadd.f32 1.0, %v4658_v30  ;;  %v6301_v21 = vadd.f32 %v6186_v43, %v2650_v50  ;;  %v2404_v3 = vadd.f32 %v6131_v51, %v2260_v16  ;;  %v2407_v35 = vadd.f32 %v6136_v19, %v2263_v33  ;;  %v2174_v54 = vpop.permute.xlu1 %2173 }
 0x289   : > { %v4660_v23 = vpop.eup %4659  ;;  %v2635_v47 = vmul.f32 %v6234_v45, %v2578_v7  ;;  %v2636_v6 = vmul.f32 %v6241_v34, %v2590_v17 }
 0x28a   : > { %v4662_v46 = vpop.eup %4661  ;;  %v2749_v31 = vadd.f32 1.0, %v4660_v23  ;;  %4665 = vrcp.f32 %v2751_v32  ;;  %v4268_v22 = vmul.f32 -1.442695, %v6301_v21  ;;  %v2649_v13 = vadd.f32 %v2633_v20, %v2404_v3  ;;  %v2182_v39 = vpop.permute.xlu0 %2181 }
 0x28b   : > { %v2752_v41 = vadd.f32 1.0, %v4662_v46  ;;  %v2651_v49 = vadd.f32 %v2635_v47, %v2406_v27  ;;  %v2652_v60 = vadd.f32 %v2636_v6, %v2407_v35  ;;  %v2212_v51 = vsel %vm2201_vm3, %v2174_v54, %v2182_v39 }
 0x28c   : > { %4667 = vrcp.f32 %v2749_v31  ;;  %v2265_v19 = vmul.f32 %v6201_v9, %v2212_v51  ;;  %v2190_v56 = vpop.permute.xlu1 %2189  ;;  %v6312_v8 = vadd.f32 %v6186_v43, %v2649_v13 }
 0x28d   : > { %4669 = vpow2.f32 %v4268_v22  ;;  %v6315_v28 = vadd.f32 %v6186_v43, %v2651_v49  ;;  %v6318_v53 = vadd.f32 %v6186_v43, %v2652_v60  ;;  %v2208_v38 = vsel %vm2201_vm3, %v2182_v39, %v2190_v56 }
 0x28e   : > { %4671 = vrcp.f32 %v2752_v41  ;;  %v2409_v55 = vadd.f32 %v6139_v36, %v2265_v19  ;;  %v2266_v40 = vmul.f32 %v6209_v1, %v2208_v38  ;;  %v2198_v27 = vpop.permute.xlu0 %2197  ;;  %v4267_v48 = vmul.f32 -1.442695, %v6312_v8 }
 0x28f   : > { %v4269_v25 = vmul.f32 -1.442695, %v6315_v28  ;;  %v4270_v58 = vmul.f32 -1.442695, %v6318_v53  ;;  %v2204_v5 = vsel %vm2201_vm3, %v2190_v56, %v2198_v27  ;;  %v2216_v43 = vsel %vm2201_vm3, %v2198_v27, %v2174_v54 }
 0x290   : > { %v2410_v26 = vadd.f32 %v6147_v63, %v2266_v40  ;;  %v2264_v50 = vmul.f32 %v6227_v57, %v2216_v43  ;;  %v2267_v36 = vmul.f32 %v6230_v52, %v2204_v5  ;;  %v2557_v16 = vpop.permute.xlu1 %2556  ;;  %4673 = vpow2.f32 %v4267_v48  ;;  %v4664_v20 = vpop.eup %4663 }
 0x291   : > { %4675 = vpow2.f32 %v4269_v25  ;;  %v6350_v13 = vmul.f32 %v4664_v20, %v6256_v14 }
 0x292   : > { %4677 = vpow2.f32 %v4270_v58  ;;  %v2408_v33 = vadd.f32 %v6154_v29, %v2264_v50  ;;  %v2411_v0 = vadd.f32 %v6156_v4, %v2267_v36  ;;  %v2549_v30 = vpop.permute.xlu0 %2548 }
 0x293   : > { %v2587_v7 = vsel %vm2576_vm4, %v2549_v30, %v2557_v16 }
 0x294   : > { %v4666_v17 = vpop.eup %4665  ;;  %v2637_v63 = vmul.f32 %v6237_v61, %v2587_v7  ;;  %v2573_v23 = vpop.permute.xlu1 %2572 }
 0x295   : > { %v2591_v3 = vsel %vm2576_vm4, %v2573_v23, %v2549_v30  ;;  %v6360_v19 = vmul.f32 %v4666_v17, %v6265_v15 }
 0x296   : > { %v4668_v32 = vpop.eup %4667  ;;  %v2653_v54 = vadd.f32 %v2637_v63, %v2408_v33  ;;  %v2640_v46 = vmul.f32 %v6241_v34, %v2591_v3  ;;  %v2565_v29 = vpop.permute.xlu0 %2564 }
 0x297   : > { %v4670_v35 = vpop.eup %4669  ;;  %v6343_v4 = vmul.f32 %v4668_v32, %v6268_v59  ;;  %v2579_v31 = vsel %vm2576_vm4, %v2565_v29, %v2573_v23  ;;  %v2583_v22 = vsel %vm2576_vm4, %v2557_v16, %v2565_v29 }
 0x298   : > { %v4672_v47 = vpop.eup %4671  ;;  %v2754_v6 = vadd.f32 1.0, %v4670_v35  ;;  %v6353_v39 = vadd.f32 %v6193_v24, %v2653_v54  ;;  %v2656_v41 = vadd.f32 %v2640_v46, %v2411_v0  ;;  %v2638_v49 = vmul.f32 %v6214_v18, %v2583_v22  ;;  %v2184_v60 = vpop.permute.xlu1 %2183 }
 0x299   : > { %v2639_v59 = vmul.f32 %v6234_v45, %v2579_v31  ;;  %v2826_v51 = vadd.f32 %v6350_v13, %v6343_v4  ;;  %v6363_v56 = vmul.f32 %v4672_v47, %v6271_v37 }
 0x29a   : > { %v4674_v14 = vpop.eup %4673  ;;  %v4271_v38 = vmul.f32 -1.442695, %v6353_v39  ;;  %v6367_v40 = vadd.f32 %v6193_v24, %v2656_v41  ;;  %v2654_v27 = vadd.f32 %v2638_v49, %v2409_v55  ;;  %4679 = vrcp.f32 %v2754_v6 }
 0x29b   : > { %v2655_v48 = vadd.f32 %v2639_v59, %v2410_v26  ;;  %v2176_v25 = vpop.permute.xlu0 %2175  ;;  %v4676_v58 = vpop.eup %4675  ;;  %2827 = vadd.xlane.f32.xlu1 %v2826_v51  ;;  %v2944_v5 = vadd.f32 %v6363_v56, %v6360_v19  ;;  %v2753_v17 = vadd.f32 1.0, %v4674_v14 }
 0x29c   : > { %v2213_v15 = vsel %vm2201_vm3, %v2176_v25, %v2184_v60  ;;  %v4678_v37 = vpop.eup %4677  ;;  %v2755_v43 = vadd.f32 1.0, %v4676_v58  ;;  %4681 = vpow2.f32 %v4271_v38  ;;  %v4274_v50 = vmul.f32 -1.442695, %v6367_v40  ;;  %v2200_v55 = vpop.permute.xlu1 %2199 }
 0x29d   : > { %v6375_v36 = vadd.f32 %v6193_v24, %v2654_v27  ;;  %v2756_v26 = vadd.f32 1.0, %v4678_v37  ;;  %v6378_v16 = vadd.f32 %v6193_v24, %v2655_v48  ;;  %2945 = vadd.xlane.f32.xlu0 %v2944_v5  ;;  %v2217_v33 = vsel %vm2201_vm3, %v2200_v55, %v2176_v25 }
 0x29e   : > { %v2269_v0 = vmul.f32 %v6201_v9, %v2213_v15  ;;  %4683 = vrcp.f32 %v2755_v43  ;;  %v2268_v20 = vmul.f32 %v6227_v57, %v2217_v33 }
 0x29f   : > { %v4272_v30 = vmul.f32 -1.442695, %v6375_v36  ;;  %v2192_v7 = vpop.permute.xlu0 %2191  ;;  %4685 = vrcp.f32 %v2756_v26  ;;  %v4273_v63 = vmul.f32 -1.442695, %v6378_v16 }
 0x2a0   : > { %v2413_v23 = vadd.f32 %v6164_v42, %v2269_v0  ;;  %v2205_v24 = vsel %vm2201_vm3, %v2192_v7, %v2200_v55  ;;  %4687 = vpow2.f32 %v4274_v50  ;;  %v2412_v32 = vadd.f32 %v6161_v10, %v2268_v20  ;;  %v2551_v3 = vpop.permute.xlu1 %2550 }
 0x2a1   : > { %v2209_v9 = vsel %vm2201_vm3, %v2184_v60, %v2192_v7  ;;  %v2271_v35 = vmul.f32 %v6230_v52, %v2205_v24  ;;  %4689 = vpow2.f32 %v4272_v30 }
 0x2a2   : > { %v2270_v57 = vmul.f32 %v6209_v1, %v2209_v9  ;;  %4691 = vpow2.f32 %v4273_v63 }
 0x2a3   : > { %v2415_v54 = vadd.f32 %v6170_v2, %v2271_v35  ;;  %v2559_v46 = vpop.permute.xlu0 %2558  ;;  %4693 = vrcp.f32 %v2753_v17 }
 0x2a4   : > { %v2414_v42 = vadd.f32 %v6167_v44, %v2270_v57  ;;  %v2588_v29 = vsel %vm2576_vm4, %v2551_v3, %v2559_v46  ;;  %v2567_v10 = vpop.permute.xlu1 %2566  ;;  %v4680_v6 = vpop.eup %4679 }
 0x2a5   : > { %v2641_v47 = vmul.f32 %v6237_v61, %v2588_v29  ;;  %v2584_v52 = vsel %vm2576_vm4, %v2559_v46, %v2567_v10 }
 0x2a6   : > { %v4682_v31 = vpop.eup %4681  ;;  %v2642_v1 = vmul.f32 %v6214_v18, %v2584_v52 }
 0x2a7   : > { %v2657_v22 = vadd.f32 %v2641_v47, %v2412_v32  ;;  %v2575_v41 = vpop.permute.xlu0 %2574  ;;  %v2757_v2 = vadd.f32 1.0, %v4682_v31 }
 0x2a8   : > { %v2580_v44 = vsel %vm2576_vm4, %v2567_v10, %v2575_v41  ;;  %v2592_v49 = vsel %vm2576_vm4, %v2575_v41, %v2551_v3  ;;  %v4684_v59 = vpop.eup %4683  ;;  %v2658_v60 = vadd.f32 %v2642_v1, %v2413_v23 }
 0x2a9   : > { %v2697_v61 = vadd.f32 %v6191_v11, %v2657_v22  ;;  %v2643_v51 = vmul.f32 %v6234_v45, %v2580_v44  ;;  %v2644_v14 = vmul.f32 %v6241_v34, %v2592_v49  ;;  %v4686_v38 = vpop.eup %4685  ;;  %4695 = vrcp.f32 %v2757_v2 }
 0x2aa   : > { %v4688_v27 = vpop.eup %4687  ;;  %v2698_v18 = vadd.f32 %v6191_v11, %v2658_v60  ;;  %v6411_v12 = vmul.f32 %v4684_v59, %v6315_v28  ;;  %v6414_v37 = vmul.f32 %v4686_v38, %v6318_v53  ;;  %v6424_v53 = vmul.f32 %v4680_v6, %v6301_v21 }
 0x2ab   : > { %v4275_v48 = vmul.f32 -1.442695, %v2697_v61  ;;  %v2659_v25 = vadd.f32 %v2643_v51, %v2414_v42  ;;  %v2660_v58 = vadd.f32 %v2644_v14, %v2415_v54  ;;  %v4690_v5 = vpop.eup %4689  ;;  %v2760_v15 = vadd.f32 1.0, %v4688_v27  ;;  %v2814_v51 = vld [vmem:[%s6820_s7 + $0x8] sm:$0xff] }
 0x2ac   : > { %v4692_v43 = vpop.eup %4691  ;;  %v2758_v45 = vadd.f32 1.0, %v4690_v5  ;;  %v4276_v34 = vmul.f32 -1.442695, %v2698_v18  ;;  %v2947_v0 = vadd.f32 %v6414_v37, %v6411_v12 }
 0x2ad   : > { %4697 = vpow2.f32 %v4275_v48  ;;  %v2699_v50 = vadd.f32 %v6191_v11, %v2659_v25  ;;  %v4694_v55 = vpop.eup %4693  ;;  %v2759_v26 = vadd.f32 1.0, %v4692_v43  ;;  %v2700_v33 = vadd.f32 %v6191_v11, %v2660_v58  ;;  %v2813_v48 = vld [vmem:[%s6820_s7] sm:$0xff]  ;;  %v2815_v25 = vld [vmem:[%s6820_s7 + $0x10] sm:$0xff] }
 0x2ae   : > { %4699 = vrcp.f32 %v2760_v15  ;;  %v6421_v30 = vmul.f32 %v4694_v55, %v6312_v8  ;;  %2948 = vadd.xlane.f32.xlu1 %v2947_v0 }
 0x2af   : > { %4701 = vrcp.f32 %v2758_v45  ;;  %v4277_v28 = vmul.f32 -1.442695, %v2699_v50  ;;  %v4278_v20 = vmul.f32 -1.442695, %v2700_v33 }
 0x2b0   : > { %4703 = vrcp.f32 %v2759_v26  ;;  %v2829_v7 = vadd.f32 %v6424_v53, %v6421_v30 }
 0x2b1   : > { %4705 = vpow2.f32 %v4276_v34 }
 0x2b2   : > { %4707 = vpow2.f32 %v4277_v28  ;;  %2830 = vadd.xlane.f32.xlu0 %v2829_v7 }
 0x2b3   : > { %4709 = vpow2.f32 %v4278_v20  ;;  %v4696_v11 = vpop.eup %4695 }
 0x2b4   : > { %v6432_v32 = vmul.f32 %v4696_v11, %v6353_v39 }
 0x2b7   : > { %v4698_v17 = vpop.eup %4697 }
 0x2b8   : > { %v4700_v63 = vpop.eup %4699  ;;  %v2761_v23 = vadd.f32 1.0, %v4698_v17 }
 0x2b9   : > { %v4702_v24 = vpop.eup %4701  ;;  %v6429_v8 = vmul.f32 %v4700_v63, %v6367_v40 }
 0x2ba   : > { %v4704_v21 = vpop.eup %4703  ;;  %4711 = vrcp.f32 %v2761_v23  ;;  %v6435_v3 = vmul.f32 %v4702_v24, %v6375_v36 }
 0x2bb   : > { %v4706_v9 = vpop.eup %4705  ;;  %v6438_v35 = vmul.f32 %v4704_v21, %v6378_v16 }
 0x2bc   : > { %v4708_v57 = vpop.eup %4707  ;;  %v2762_v54 = vadd.f32 1.0, %v4706_v9  ;;  %v2832_v46 = vadd.f32 %v6435_v3, %v6432_v32 }
 0x2bd   : > { %v4710_v42 = vpop.eup %4709  ;;  %v2763_v40 = vadd.f32 1.0, %v4708_v57  ;;  %v2950_v29 = vadd.f32 %v6429_v8, %v6438_v35 }
 0x2be   : > { %4713 = vrcp.f32 %v2762_v54  ;;  %v2764_v39 = vadd.f32 1.0, %v4710_v42  ;;  %2833 = vadd.xlane.f32.xlu0 %v2832_v46 }
 0x2bf   : > { %4715 = vrcp.f32 %v2763_v40  ;;  %2951 = vadd.xlane.f32.xlu1 %v2950_v29 }
 0x2c0   : > { %4717 = vrcp.f32 %v2764_v39 }
 0x2c4   : > { %v4712_v36 = vpop.eup %4711 }
 0x2c5   : > { %v6444_v10 = vmul.f32 %v4712_v36, %v2697_v61 }
 0x2c8   : > { %v4714_v16 = vpop.eup %4713 }
 0x2c9   : > { %v4716_v47 = vpop.eup %4715  ;;  %v6446_v6 = vmul.f32 %v4714_v16, %v2698_v18 }
 0x2ca   : > { %v4718_v52 = vpop.eup %4717  ;;  %v6448_v31 = vmul.f32 %v4716_v47, %v2699_v50 }
 0x2cb   : > { %v2835_v1 = vadd.f32 %v6446_v6, %v6444_v10  ;;  %v6452_v22 = vmul.f32 %v4718_v52, %v2700_v33  ;;  %v2816_v33 = vld [vmem:[%s6820_s7 + $0x18] sm:$0xff] }
 0x2cd   : > { %2836 = vadd.xlane.f32.xlu0 %v2835_v1  ;;  %v2953_v41 = vadd.f32 %v6452_v22, %v6448_v31 }
 0x2cf   : > { %2954 = vadd.xlane.f32.xlu1 %v2953_v41 }
 0x328   : > { %v2828_v44 = vpop.xlane.xlu1 %2827 }
 0x329   : > { %v2838_v38 = vmul.f32 0.00390625, %v2828_v44 }
 0x32a   : > { %v2946_v2 = vpop.xlane.xlu0 %2945 }
 0x32b   : > { %v2956_v58 = vmul.f32 0.00390625, %v2946_v2  ;;  %v2842_v43 = vmul.f32 %v2838_v38, %v2813_v48 }
 0x32d   : > { %v2960_v50 = vmul.f32 %v2956_v58, %v2813_v48  ;;  %v2847_v28 = vsel %vm2846_vm5, %v2842_v43, 0.0 }
 0x32f   : > { %v2964_v23 = vsel %vm2846_vm5, %v2960_v50, 0.0  ;;  %v2818_v50 = vld [vmem:[%s6822_s9 + $0x8] sm:$0xff] }
 0x33b   : > { %v2949_v59 = vpop.xlane.xlu1 %2948 }
 0x33c   : > { %v2957_v27 = vmul.f32 0.00390625, %v2949_v59 }
 0x33e   : > { %v2961_v45 = vmul.f32 %v2957_v27, %v2814_v51 }
 0x33f   : > { %v2831_v49 = vpop.xlane.xlu0 %2830 }
 0x340   : > { %v2839_v61 = vmul.f32 0.00390625, %v2831_v49  ;;  %v2965_v20 = vsel %vm2846_vm5, %v2961_v45, 0.0 }
 0x341   : > { %v2966_v57 = vadd.f32 %v2965_v20, %v2964_v23  ;;  %v2820_v23 = vld [vmem:[%s6822_s9 + $0x18] sm:$0xff] }
 0x342   : > { %v2843_v5 = vmul.f32 %v2839_v61, %v2814_v51 }
 0x344   : > { %v2848_v55 = vsel %vm2846_vm5, %v2843_v5, 0.0 }
 0x345   : > { %v2849_v17 = vadd.f32 %v2848_v55, %v2847_v28  ;;  %v2817_v55 = vld [vmem:[%s6822_s9] sm:$0xff] }
 0x34b   : > { %v2834_v60 = vpop.xlane.xlu0 %2833 }
 0x34c   : > { %v2952_v14 = vpop.xlane.xlu1 %2951  ;;  %v2840_v18 = vmul.f32 0.00390625, %v2834_v60  ;;  %v2821_v60 = vld [vmem:[%s6821_s8] sm:$0x1] }
 0x34d   : > { %v2958_v15 = vmul.f32 0.00390625, %v2952_v14 }
 0x34e   : > { %v2844_v34 = vmul.f32 %v2840_v18, %v2815_v25 }
 0x34f   : > { %v2962_v26 = vmul.f32 %v2958_v15, %v2815_v25 }
 0x350   : > { %v2850_v7 = vsel %vm2846_vm5, %v2844_v34, 0.0 }
 0x351   : > { %v2967_v24 = vsel %vm2846_vm5, %v2962_v26, 0.0  ;;  %v2851_v54 = vadd.f32 %v2850_v7, %v2849_v17 }
 0x352   : > { %v2968_v40 = vadd.f32 %v2967_v24, %v2966_v57  ;;  %v2819_v24 = vld [vmem:[%s6822_s9 + $0x10] sm:$0xff] }
 0x35a   : > { %v2837_v0 = vpop.xlane.xlu0 %2836 }
 0x35b   : > { %v2841_v11 = vmul.f32 0.00390625, %v2837_v0 }
 0x35c   : > { %v2955_v63 = vpop.xlane.xlu1 %2954 }
 0x35d   : > { %v2845_v21 = vmul.f32 %v2841_v11, %v2816_v33  ;;  %v2959_v9 = vmul.f32 0.00390625, %v2955_v63 }
 0x35f   : > { %v2852_v46 = vsel %vm2846_vm5, %v2845_v21, 0.0  ;;  %v2963_v42 = vmul.f32 %v2959_v9, %v2816_v33 }
 0x360   : > { %v2853_v29 = vadd.f32 %v2852_v46, %v2851_v54 }
 0x361   : > { %v2969_v39 = vsel %vm2846_vm5, %v2963_v42, 0.0 }
 0x362   : > { %v2854_v36 = vrot.slane %v2853_v29, 4  ;;  %v2970_v16 = vadd.f32 %v2969_v39, %v2968_v40 }
 0x364   : > { %v2855_v47 = vadd.f32 %v2854_v36, %v2853_v29  ;;  %v2971_v52 = vrot.slane %v2970_v16, 4  ;;  %v2823_v36 = vld [vmem:[%s6823_s10 + $0x8] sm:$0xff] }
 0x366   : > { %v2856_v1 = vrot.slane %v2855_v47, 2  ;;  %v2972_v41 = vadd.f32 %v2971_v52, %v2970_v16  ;;  %v2822_v16 = vld [vmem:[%s6823_s10] sm:$0xff] }
 0x368   : > { %v2857_v2 = vadd.f32 %v2856_v1, %v2855_v47  ;;  %v2973_v44 = vrot.slane %v2972_v41, 2 }
 0x36a   : > { %v2858_v49 = vrot.slane %v2857_v2, 1  ;;  %v2974_v59 = vadd.f32 %v2973_v44, %v2972_v41 }
 0x36c   : > { %v2859_v61 = vadd.f32 %v2858_v49, %v2857_v2  ;;  %v2975_v51 = vrot.slane %v2974_v59, 1 }
 0x36e   : > { %v2860_v14 = vadd.f32 %v2859_v61, %v2821_v60  ;;  %v2976_v38 = vadd.f32 %v2975_v51, %v2974_v59  ;;  %v2825_v51 = vld [vmem:[%s6823_s10 + $0x18] sm:$0xff] }
 0x370   : > { %v4279_v27 = vmul.f32 -1.442695, %v2860_v14  ;;  %v2977_v18 = vadd.f32 %v2976_v38, %v2821_v60 }
 0x372   : > { %4719 = vpow2.f32 %v4279_v27  ;;  %v4284_v48 = vmul.f32 -1.442695, %v2977_v18 }
 0x374   : > { %4721 = vpow2.f32 %v4284_v48 }
 0x37c   : > { %v4720_v25 = vpop.eup %4719 }
 0x37d   : > { %v2864_v58 = vadd.f32 1.0, %v4720_v25 }
 0x37e   : > { %v4722_v5 = vpop.eup %4721 }
 0x37f   : > { %4723 = vrcp.f32 %v2864_v58  ;;  %v2981_v15 = vadd.f32 1.0, %v4722_v5 }
 0x381   : > { %4725 = vrcp.f32 %v2981_v15 }
 0x389   : > { %v4724_v43 = vpop.eup %4723 }
 0x38a   : > { %v2867_v45 = vmul.f32 %v4724_v43, %v2860_v14  ;;  %v2824_v14 = vld [vmem:[%s6823_s10 + $0x10] sm:$0xff] }
 0x38b   : > { %v4726_v34 = vpop.eup %4725 }
 0x38c   : > { %v2871_v26 = vrot.slane %v2867_v45, %v6974_v62  ;;  %v2984_v33 = vmul.f32 %v4726_v34, %v2977_v18 }
 0x38e   : > { %v2873_v0 = vmul.f32 %v2871_v26, %v2818_v50  ;;  %v2872_v28 = vmul.f32 %v2871_v26, %v2817_v55  ;;  %v2988_v20 = vrot.slane %v2984_v33, %v6974_v62  ;;  %v2875_v9 = vmul.f32 %v2871_v26, %v2820_v23 }
 0x38f   : > { %v2874_v57 = vmul.f32 %v2871_v26, %v2819_v24 }
 0x390   : > { %v2879_v7 = vsel %vm2846_vm5, %v2873_v0, 0.0  ;;  %v2876_v11 = vsel %vm2846_vm5, %v2872_v28, 0.0  ;;  %v2990_v17 = vmul.f32 %v2988_v20, %v2818_v50  ;;  %v2989_v63 = vmul.f32 %v2988_v20, %v2817_v55 }
 0x391   : > { %2880 = vadd.xlane.f32.xlu1 %v2879_v7  ;;  %2877 = vadd.xlane.f32.xlu0 %v2876_v11  ;;  %v2885_v54 = vsel %vm2846_vm5, %v2875_v9, 0.0  ;;  %v2882_v46 = vsel %vm2846_vm5, %v2874_v57, 0.0  ;;  %v2992_v42 = vmul.f32 %v2988_v20, %v2820_v23  ;;  %v2991_v40 = vmul.f32 %v2988_v20, %v2819_v24 }
 0x392   : > { %v2996_v21 = vsel %vm2846_vm5, %v2990_v17, 0.0  ;;  %v2993_v62 = vsel %vm2846_vm5, %v2989_v63, 0.0 }
 0x393   : > { %v3002_v29 = vsel %vm2846_vm5, %v2992_v42, 0.0  ;;  %v2999_v39 = vsel %vm2846_vm5, %v2991_v40, 0.0 }
 0x395   : > { %2997 = vadd.xlane.f32.xlu1 %v2996_v21  ;;  %2994 = vadd.xlane.f32.xlu0 %v2993_v62 }
 0x399   : > { %2886 = vadd.xlane.f32.xlu1 %v2885_v54  ;;  %2883 = vadd.xlane.f32.xlu0 %v2882_v46 }
 0x39d   : > { %3003 = vadd.xlane.f32.xlu1 %v3002_v29  ;;  %3000 = vadd.xlane.f32.xlu0 %v2999_v39 }
 0x41e   : > { %v2881_v47 = vpop.xlane.xlu1 %2880  ;;  %v2878_v52 = vpop.xlane.xlu0 %2877 }
 0x41f   : > { %v2889_v1 = vadd.f32 %v2881_v47, %v2823_v36  ;;  %v2888_v41 = vadd.f32 %v2878_v52, %v2822_v16 }
 0x421   : > { %v4281_v2 = vmul.f32 -1.442695, %v2889_v1  ;;  %v4280_v44 = vmul.f32 -1.442695, %v2888_v41  ;;  %v3062_v1 = vld [vmem:[%s6825_s12] sm:$0xff] }
 0x422   : > { %v2998_v49 = vpop.xlane.xlu1 %2997  ;;  %v2995_v59 = vpop.xlane.xlu0 %2994  ;;  %v3061_v41 = vld [vmem:[%s6824_s11] sm:$0xff] }
 0x423   : > { %4727 = vpow2.f32 %v4281_v2  ;;  %v3006_v60 = vadd.f32 %v2998_v49, %v2823_v36  ;;  %v3005_v61 = vadd.f32 %v2995_v59, %v2822_v16  ;;  %v3070_v2 = vsel %vm3068_vm6, %v3061_v41, 0 }
 0x424   : > { %4729 = vpow2.f32 %v4280_v44  ;;  %v6519_v44 = vand.u32 4294901760, %v3070_v2 }
 0x425   : > { %v4286_v38 = vmul.f32 -1.442695, %v3006_v60  ;;  %v4285_v27 = vmul.f32 -1.442695, %v3005_v61 }
 0x426   : > { %v2887_v18 = vpop.xlane.xlu1 %2886  ;;  %v2884_v48 = vpop.xlane.xlu0 %2883  ;;  %v6522_v49 = vsub.f32 %v3070_v2, %v6519_v44 }
 0x427   : > { %4731 = vpow2.f32 %v4286_v38  ;;  %v2891_v25 = vadd.f32 %v2887_v18, %v2825_v51  ;;  %v2890_v58 = vadd.f32 %v2884_v48, %v2824_v14 }
 0x428   : > { %4733 = vpow2.f32 %v4285_v27  ;;  %v6529_v27 = vand.u32 4294901760, %v6522_v49 }
 0x429   : > { %v4283_v5 = vmul.f32 -1.442695, %v2891_v25  ;;  %v4282_v15 = vmul.f32 -1.442695, %v2890_v58 }
 0x42a   : > { %v3004_v43 = vpop.xlane.xlu1 %3003  ;;  %v3001_v45 = vpop.xlane.xlu0 %3000 }
 0x42b   : > { %4735 = vpow2.f32 %v4283_v5  ;;  %v3008_v34 = vadd.f32 %v3004_v43, %v2825_v51  ;;  %v3007_v50 = vadd.f32 %v3001_v45, %v2824_v14 }
 0x42c   : > { %4737 = vpow2.f32 %v4282_v15 }
 0x42d   : > { %v4728_v55 = vpop.eup %4727  ;;  %v4288_v26 = vmul.f32 -1.442695, %v3008_v34  ;;  %v4287_v28 = vmul.f32 -1.442695, %v3007_v50 }
 0x42e   : > { %v4730_v33 = vpop.eup %4729  ;;  %v2905_v0 = vadd.f32 1.0, %v4728_v55 }
 0x42f   : > { %v2904_v20 = vadd.f32 1.0, %v4730_v33  ;;  %4739 = vpow2.f32 %v4288_v26 }
 0x430   : > { %4741 = vrcp.f32 %v2905_v0 }
 0x431   : > { %v4732_v7 = vpop.eup %4731  ;;  %4743 = vrcp.f32 %v2904_v20 }
 0x432   : > { %v4734_v11 = vpop.eup %4733  ;;  %v3022_v17 = vadd.f32 1.0, %v4732_v7  ;;  %4745 = vpow2.f32 %v4287_v28 }
 0x433   : > { %v3021_v63 = vadd.f32 1.0, %v4734_v11 }
 0x434   : > { %4747 = vrcp.f32 %v3022_v17 }
 0x435   : > { %v4736_v23 = vpop.eup %4735  ;;  %4749 = vrcp.f32 %v3021_v63 }
 0x436   : > { %v4738_v24 = vpop.eup %4737  ;;  %v2907_v21 = vadd.f32 1.0, %v4736_v23 }
 0x437   : > { %v2906_v62 = vadd.f32 1.0, %v4738_v24 }
 0x438   : > { %4751 = vrcp.f32 %v2907_v21 }
 0x439   : > { %v4740_v9 = vpop.eup %4739  ;;  %4753 = vrcp.f32 %v2906_v62 }
 0x43a   : > { %v4742_v57 = vpop.eup %4741  ;;  %v3024_v54 = vadd.f32 1.0, %v4740_v9 }
 0x43b   : > { %v4744_v46 = vpop.eup %4743  ;;  %2923 = vperm.xlu1 %4590, %v4742_v57  }
 0x43c   : > { %v4746_v42 = vpop.eup %4745  ;;  %4755 = vrcp.f32 %v3024_v54  ;;  %2918 = vperm.xlu0 %4588, %v4744_v46  }
 0x43d   : > { %v3023_v40 = vadd.f32 1.0, %v4746_v42 }
 0x43e   : > { %v4748_v29 = vpop.eup %4747 }
 0x43f   : > { %v4750_v39 = vpop.eup %4749  ;;  %4757 = vrcp.f32 %v3023_v40 }
 0x440   : > { %3040 = vperm.xlu0 %4588, %v4748_v29   ;;  %3035 = vperm.xlu1 %4590, %v4750_v39  }
 0x442   : > { %v4752_v36 = vpop.eup %4751 }
 0x443   : > { %v4754_v16 = vpop.eup %4753 }
 0x444   : > { %2933 = vperm.xlu0 %4588, %v4752_v36   ;;  %2928 = vperm.xlu1 %4590, %v4754_v16  }
 0x446   : > { %v4756_v47 = vpop.eup %4755 }
 0x448   : > { %3050 = vperm.xlu0 %4588, %v4756_v47  }
 0x449   : > { %v4758_v52 = vpop.eup %4757 }
 0x44a   : > { %3045 = vperm.xlu1 %4590, %v4758_v52  }
 0x44e   : > { %3065 = vperm.xlu1 %4590, %v3062_v1  }
 0x4ba   : > { %v2924_v59 = vpop.permute.xlu1 %2923 }
 0x4bb   : > { %v2938_v60 = vmul.f32 %v2924_v59, %v6421_v30  ;;  %v2939_v61 = vmul.f32 %v2924_v59, %v6424_v53  ;;  %v2919_v51 = vpop.permute.xlu0 %2918 }
 0x4bc   : > { %v2936_v14 = vmul.f32 %v2919_v51, %v6343_v4  ;;  %v2937_v38 = vmul.f32 %v2919_v51, %v6350_v13  ;;  %v3148_v4 = vsub.f32 %v6522_v49, %v6529_v27 }
 0x4bd   : > { %v3076_v18 = vand.u32 4294901760, %v2939_v61  ;;  %v3078_v48 = vand.u32 4294901760, %v2938_v60 }
 0x4be   : > { %v3072_v25 = vand.u32 4294901760, %v2937_v38  ;;  %v3074_v58 = vand.u32 4294901760, %v2936_v14  ;;  %v6568_v62 = vand.u32 4294901760, %v3148_v4 }
 0x4bf   : > { %v6531_v5 = vsub.f32 %v2938_v60, %v3078_v48  ;;  %v3036_v15 = vpop.permute.xlu1 %3035  ;;  %v3041_v43 = vpop.permute.xlu0 %3040  ;;  %v6533_v45 = vsub.f32 %v2939_v61, %v3076_v18 }
 0x4c0   : > { %v6535_v30 = vsub.f32 %v2936_v14, %v3074_v58  ;;  %v3053_v53 = vmul.f32 %v3036_v15, %v6360_v19  ;;  %v6541_v34 = vpack.c.bf16 %v3078_v48, %v3074_v58  ;;  %v3054_v50 = vmul.f32 %v3036_v15, %v6363_v56 }
 0x4c1   : > { %v3176_v13 = vand.u32 4294901760, %v6531_v5  ;;  %v3055_v55 = vmul.f32 %v3041_v43, %v6411_v12  ;;  %v6545_v26 = vsub.f32 %v2937_v38, %v3072_v25  ;;  %v3056_v28 = vmul.f32 %v3041_v43, %v6414_v37 }
 0x4c2   : > { %v3164_v33 = vand.u32 4294901760, %v6535_v30  ;;  %v3617_v0 = vand.u32 4294901760, %v3053_v53  ;;  %v3615_v20 = vand.u32 4294901760, %v3054_v50  ;;  %v6554_v11 = vpack.c.bf16 %v3076_v18, %v3072_v25 }
 0x4c3   : > { %v6552_v19 = vsub.f32 %v6531_v5, %v3176_v13  ;;  %v3621_v7 = vand.u32 4294901760, %v3055_v55  ;;  %v2929_v17 = vpop.permute.xlu1 %2928  ;;  %v3619_v63 = vand.u32 4294901760, %v3056_v28  ;;  %v2934_v23 = vpop.permute.xlu0 %2933  ;;  %v3170_v24 = vand.u32 4294901760, %v6533_v45 }
 0x4c4   : > { %v6559_v56 = vsub.f32 %v6535_v30, %v3164_v33  ;;  %v6561_v12 = vsub.f32 %v3053_v53, %v3617_v0  ;;  %v2940_v37 = vmul.f32 %v2929_v17, %v6432_v32  ;;  %v6565_v21 = vsub.f32 %v3054_v50, %v3615_v20  ;;  %4296 = vmatprep.subr.bf16.mxu0 %v6554_v11 }
 0x4c5   : > { %v3158_v9 = vand.u32 4294901760, %v6545_v26  ;;  %v6572_v54 = vsub.f32 %v3055_v55, %v3621_v7  ;;  %v2941_v46 = vmul.f32 %v2929_v17, %v6435_v3  ;;  %4298 = vmatpush1.bf16.msra.mxu0 %v6541_v34  ;;  %v3178_v32 = vand.u32 4294901760, %v6552_v19 }
 0x4c6   : > { %v3707_v57 = vand.u32 4294901760, %v6561_v12  ;;  %v6577_v42 = vsub.f32 %v3056_v28, %v3619_v63  ;;  %v3082_v40 = vand.u32 4294901760, %v2940_v37  ;;  %v2942_v29 = vmul.f32 %v2934_v23, %v6444_v10 }
 0x4c7   : > { %v3166_v39 = vand.u32 4294901760, %v6559_v56  ;;  %v6581_v36 = vpack.c.bf16 %v3621_v7, %v3617_v0  ;;  %v3080_v16 = vand.u32 4294901760, %v2941_v46  ;;  %v2943_v47 = vmul.f32 %v2934_v23, %v6446_v6  ;;  %v3051_v51 = vpop.permute.xlu0 %3050 }
 0x4c8   : > { %v3701_v52 = vand.u32 4294901760, %v6565_v21  ;;  %v6585_v1 = vsub.f32 %v2940_v37, %v3082_v40  ;;  %v3086_v3 = vand.u32 4294901760, %v2942_v29  ;;  %v6587_v41 = vpack.c.bf16 %v3619_v63, %v3615_v20 }
 0x4c9   : > { %v3046_v2 = vpop.permute.xlu1 %3045  ;;  %v6592_v59 = vsub.f32 %v6561_v12, %v3707_v57  ;;  %v6857_v10 = vand.u32 4294901760, %v6572_v54  ;;  %v3084_v60 = vand.u32 4294901760, %v2943_v47  ;;  %v3713_v6 = vand.u32 4294901760, %v6577_v42 }
 0x4ca   : > { %v3057_v61 = vmul.f32 %v3046_v2, %v6438_v35  ;;  %v6597_v14 = vsub.f32 %v2941_v46, %v3080_v16  ;;  %v3188_v38 = vand.u32 4294901760, %v6585_v1  ;;  %v6600_v18 = vsub.f32 %v2942_v29, %v3086_v3  ;;  %4344 = vmatprep.subr.bf16.mxu1 %v6587_v41 }
 0x4cb   : > { %v6603_v48 = vpack.c.bf16 %v3086_v3, %v3082_v40  ;;  %v6605_v25 = vsub.f32 %v2943_v47, %v3084_v60  ;;  %v3058_v58 = vmul.f32 %v3046_v2, %v6429_v8  ;;  %4346 = vmatpush1.bf16.msra.mxu1 %v6581_v36  ;;  %v3059_v53 = vmul.f32 %v3051_v51, %v6448_v31 }
 0x4cc   : > { %v3625_v15 = vand.u32 4294901760, %v3057_v61  ;;  %v3189_v35 = vsub.f32 %v6585_v1, %v3188_v38  ;;  %v3200_v43 = vand.u32 4294901760, %v6600_v18  ;;  %v3060_v4 = vmul.f32 %v3051_v51, %v6452_v22 }
 0x4cd   : > { %v3720_v50 = vsub.f32 %v6572_v54, %v6857_v10  ;;  %v3623_v55 = vand.u32 4294901760, %v3058_v58  ;;  %v6620_v8 = vpack.c.bf16 %v3084_v60, %v3080_v16  ;;  %v3182_v28 = vand.u32 4294901760, %v6597_v14 }
 0x4ce   : > { %v6618_v0 = vsub.f32 %v3057_v61, %v3625_v15  ;;  %v3201_v19 = vsub.f32 %v6600_v18, %v3200_v43  ;;  %v3627_v20 = vand.u32 4294901760, %v3060_v4  ;;  %v3629_v7 = vand.u32 4294901760, %v3059_v53 }
 0x4cf   : > { %v6626_v31 = vsub.f32 %v3058_v58, %v3623_v55  ;;  %4300 = vmatprep.subr.bf16.mxu0 %v6620_v8  ;;  %v3159_v17 = vsub.f32 %v6545_v26, %v3158_v9  ;;  %v3171_v56 = vsub.f32 %v6533_v45, %v3170_v24  ;;  %v3190_v63 = vand.u32 4294901760, %v3189_v35 }
 0x4d0   : > { %v6856_v22 = vand.u32 4294901760, %v6618_v0  ;;  %v3194_v37 = vand.u32 4294901760, %v6605_v25  ;;  %v6637_v23 = vsub.f32 %v3060_v4, %v3627_v20  ;;  %v6639_v46 = vsub.f32 %v3059_v53, %v3629_v7  ;;  %4302 = vmatpush1.bf16.msra.mxu0 %v6603_v48 }
 0x4d1   : > { %v3202_v40 = vand.u32 4294901760, %v3201_v19  ;;  %v6642_v29 = vpack.c.bf16 %v3629_v7, %v3625_v15  ;;  %v3160_v16 = vand.u32 4294901760, %v3159_v17  ;;  %v3172_v47 = vand.u32 4294901760, %v3171_v56 }
 0x4d2   : > { %v3725_v3 = vand.u32 4294901760, %v6626_v31  ;;  %v3732_v2 = vsub.f32 %v6618_v0, %v6856_v22  ;;  %v6855_v60 = vand.u32 4294901760, %v6639_v46  ;;  %v6649_v61 = vpack.c.bf16 %v3627_v20, %v3623_v55 }
 0x4d3   : > { %v3737_v51 = vand.u32 4294901760, %v6637_v23  ;;  %v4303_v58 = vpack.c.bf16 %v3172_v47, %v3160_v16  ;;  %3150 = vmatmul.mubr.f32.vlgmr.msra.gmra.mrb[8].mxu0 %v6568_v62  ;;  %v4305_v35 = vpack.c.bf16 %v3178_v32, %v3166_v39  ;;  %v3702_v15 = vsub.f32 %v6565_v21, %v3701_v52 }
 0x4d4   : > { %v3744_v53 = vsub.f32 %v6639_v46, %v6855_v60  ;;  %4348 = vmatprep.subr.bf16.mxu1 %v6649_v61  ;;  %v3714_v4 = vsub.f32 %v6577_v42, %v3713_v6  ;;  %v3183_v55 = vsub.f32 %v6597_v14, %v3182_v28  ;;  %v3195_v32 = vsub.f32 %v6605_v25, %v3194_v37 }
 0x4d5   : > { %v3709_v39 = vand.u32 4294901760, %v6592_v59  ;;  %v3721_v19 = vand.u32 4294901760, %v3720_v50  ;;  %4304 = vmatprep.subr.bf16.mxu0 %v4303_v58  ;;  %4350 = vmatpush1.bf16.msra.mxu1 %v6642_v29  ;;  %v3703_v20 = vand.u32 4294901760, %v3702_v15  ;;  %v3733_v7 = vand.u32 4294901760, %v3732_v2 }
 0x4d6   : > { %4306 = vmatpush1.bf16.msra.mxu0 %v4305_v35  ;;  %v3715_v17 = vand.u32 4294901760, %v3714_v4  ;;  %v3184_v56 = vand.u32 4294901760, %v3183_v55  ;;  %v3196_v16 = vand.u32 4294901760, %v3195_v32  ;;  %v6979_v47 = vmov 0.0  }
 0x4d7   : > { %3260 = vmatprep.mubr.f32.mxu0 %v6979_v47  ;;  %v3745_v60 = vand.u32 4294901760, %v3744_v53  ;;  %v4309_v22 = vpack.c.bf16 %v3202_v40, %v3190_v63  ;;  %v3726_v10 = vsub.f32 %v6626_v31, %v3725_v3  ;;  %v3738_v59 = vsub.f32 %v6637_v23, %v3737_v51 }
 0x4d8   : > { %v4351_v50 = vpack.c.bf16 %v3715_v17, %v3703_v20  ;;  %v4307_v58 = vpack.c.bf16 %v3196_v16, %v3184_v56  ;;  %3693 = vmatmul.mubr.f32.vlgmr.msra.gmra.mrb[8].mxu1 %v6568_v62  ;;  %v4353_v2 = vpack.c.bf16 %v3721_v19, %v3709_v39  ;;  %v4311_v63 = vpack.c.bf16 %v6533_v45, %v6545_v26 }
 0x4d9   : > { %v3727_v35 = vand.u32 4294901760, %v3726_v10  ;;  %v3739_v15 = vand.u32 4294901760, %v3738_v59  ;;  %3803 = vmatprep.mubr.f32.mxu1 %v6979_v47  ;;  %v4357_v53 = vpack.c.bf16 %v3745_v60, %v3733_v7  ;;  %v4313_v4 = vpack.c.bf16 %v6531_v5, %v6535_v30 }
 0x4da   : > { %4352 = vmatprep.subr.bf16.mxu1 %v4351_v50  ;;  %4308 = vmatprep.subr.bf16.mxu0 %v4307_v58  ;;  %v4315_v62 = vpack.c.bf16 %v6605_v25, %v6597_v14  ;;  %v4359_v10 = vpack.c.bf16 %v6577_v42, %v6565_v21  ;;  %v4361_v60 = vpack.c.bf16 %v6572_v54, %v6561_v12  ;;  %v6980_v30 = vand.u32 4294901760, %v6572_v54  ;;  %v4760_v42 = vld [vmem:[%s5012_s3 + $0x8] sm:$0xff] }
 0x4db   : > { %4310 = vmatpush1.bf16.msra.mxu0 %v4309_v22  ;;  %4354 = vmatpush1.bf16.msra.mxu1 %v4353_v2  ;;  %v4355_v40 = vpack.c.bf16 %v3739_v15, %v3727_v35  ;;  %v4317_v22 = vpack.c.bf16 %v6600_v18, %v6585_v1  ;;  %v4363_v55 = vpack.c.bf16 %v6637_v23, %v6626_v31  ;;  %v6982_v12 = vand.u32 4294901760, %v6639_v46 }
 0x4dc   : > { %4312 = vmatprep.subr.bf16.mxu0 %v4311_v63  ;;  %v4365_v32 = vpack.c.bf16 %v6639_v46, %v6618_v0  ;;  %v4327_v39 = vpack.c.bf16 %v3170_v24, %v3158_v9  ;;  %v4329_v19 = vpack.c.bf16 %v3176_v13, %v3164_v33  ;;  %v4375_v45 = vpack.c.bf16 %v3713_v6, %v3701_v52  ;;  %v4761_v6 = vld [vmem:[%s5012_s3 + $0x10] sm:$0xff] }
 0x4dd   : > { %4356 = vmatprep.subr.bf16.mxu1 %v4355_v40  ;;  %v4333_v5 = vpack.c.bf16 %v3200_v43, %v3188_v38  ;;  %v4377_v13 = vpack.c.bf16 %v6980_v30, %v3707_v57  ;;  %v4379_v26 = vpack.c.bf16 %v3737_v51, %v3725_v3  ;;  %v6981_v33 = vand.u32 4294901760, %v6618_v0  ;;  %v4759_v57 = vld [vmem:[%s5012_s3] sm:$0xff]  ;;  %v4762_v38 = vld [vmem:[%s5012_s3 + $0x18] sm:$0xff]  ;;  %s4841_s3 = smov [#allocation2]  }
 0x4de   : > { %3262 = vmatmul.mubr.f32.vlgmr.msra.gmra.mrb[8].mxu0 %v6519_v44  ;;  %s4767_s0 = sshll.u32 %s4841_s3, 4  ;;  %s4768_s0 = int_to_ptr.vmem [resolvable:$false] %s4767_s0 }
 0x4df   : > { %4314 = vmatpush1.bf16.msra.mxu0 %v4313_v4  ;;  %4358 = vmatpush1.bf16.msra.mxu1 %v4357_v53  ;;  %v4381_v24 = vpack.c.bf16 %v6982_v12, %v6981_v33  ;;  %s4769_s1 = scalar_lea.vmem %s4768_s0, 1024  ;;  %p4770_p0 = scmp.lt.s32.totalorder %s6773_s30, %s4768_s0 }
 0x4e0   : > { %4316 = vmatprep.subr.bf16.mxu0 %v4315_v62  ;;  %4360 = vmatprep.subr.bf16.mxu1 %v4359_v10  ;;  %p4771_p1 = scmp.lt.s32.totalorder %s4769_s1, %s4763_s16 }
 0x4e1   : > { %3348 = vmatprep.mubr.f32.mxu0 %v6979_v47 }
 0x4e2   : > { %3805 = vmatmul.mubr.f32.vlgmr.msra.gmra.mrb[8].mxu1 %v6519_v44  ;;  %p4772_p2 = por %p4771_p1, %p4770_p0 }
 0x4e3   : > { %4318 = vmatpush1.bf16.msra.mxu0 %v4317_v22  ;;  %4362 = vmatpush1.bf16.msra.mxu1 %v4361_v60 }
 0x4e4   : > { %4320 = vmatprep.subr.bf16.mxu0 %v6554_v11  ;;  %4364 = vmatprep.subr.bf16.mxu1 %v4363_v55  ;;  %p4773_p3 = pnand %p4772_p2, %p4766_p13 }
 0x4e5   : > { %3891 = vmatprep.mubr.f32.mxu1 %v6979_v47 }
 0x4e6   : > { %3351 = vmatmul.mubr.f32.vlgmr.msra.gmra.mrb[8].mxu0 %v6522_v49 }
 0x4e7   : > { %4322 = vmatpush1.bf16.msra.mxu0 %v6541_v34  ;;  %4366 = vmatpush1.bf16.msra.mxu1 %v4365_v32 }
 0x4e8   : > { %4324 = vmatprep.subr.bf16.mxu0 %v6620_v8  ;;  %4368 = vmatprep.subr.bf16.mxu1 %v6587_v41 }
 0x4e9   : > { %3429 = vmatprep.mubr.f32.mxu0 %v6979_v47 }
 0x4ea   : > { %3894 = vmatmul.mubr.f32.vlgmr.msra.gmra.mrb[8].mxu1 %v6522_v49  ;;  %v4331_v49 = vpack.c.bf16 %v3194_v37, %v3182_v28 }
 0x4eb   : > { %4326 = vmatpush1.bf16.msra.mxu0 %v6603_v48  ;;  %4370 = vmatpush1.bf16.msra.mxu1 %v6581_v36 }
 0x4ec   : > { %4328 = vmatprep.subr.bf16.mxu0 %v4327_v39  ;;  %4372 = vmatprep.subr.bf16.mxu1 %v6649_v61 }
 0x4ed   : > { %3972 = vmatprep.mubr.f32.mxu1 %v6979_v47 }
 0x4ee   : > { %3433 = vmatmul.mubr.f32.vlgmr.msra.gmra.mrb[8].mxu0 %v6529_v27 }
 0x4ef   : > { %4330 = vmatpush1.bf16.msra.mxu0 %v4329_v19  ;;  %4374 = vmatpush1.bf16.msra.mxu1 %v6642_v29 }
 0x4f0   : > { %4332 = vmatprep.subr.bf16.mxu0 %v4331_v49  ;;  %4376 = vmatprep.subr.bf16.mxu1 %v4375_v45 }
 0x4f1   : > { %3527 = vmatprep.mubr.f32.mxu0 %v6979_v47 }
 0x4f2   : > { %3976 = vmatmul.mubr.f32.vlgmr.msra.gmra.mrb[8].mxu1 %v6529_v27  ;;  %v3066_v27 = vpop.permute.xlu1 %3065 }
 0x4f3   : > { %4334 = vmatpush1.bf16.msra.mxu0 %v4333_v5  ;;  %4378 = vmatpush1.bf16.msra.mxu1 %v4377_v13 }
 0x4f4   : > { %4336 = vmatprep.subr.bf16.mxu0 %v6554_v11  ;;  %4380 = vmatprep.subr.bf16.mxu1 %v4379_v26 }
 0x4f5   : > { %4070 = vmatprep.mubr.f32.mxu1 %v6979_v47 }
 0x4f6   : > { %3529 = vmatmul.mubr.f32.vlgmr.msra.gmra.mrb[8].mxu0 %v6519_v44 }
 0x4f7   : > { %4338 = vmatpush1.bf16.msra.mxu0 %v6541_v34  ;;  %4382 = vmatpush1.bf16.msra.mxu1 %v4381_v24 }
 0x4f8   : > { %4340 = vmatprep.subr.bf16.mxu0 %v6620_v8  ;;  %4384 = vmatprep.subr.bf16.mxu1 %v6587_v41 }
 0x4f9   : > { %3607 = vmatprep.mubr.f32.mxu0 %v6979_v47 }
 0x4fa   : > { %4072 = vmatmul.mubr.f32.vlgmr.msra.gmra.mrb[8].mxu1 %v6519_v44 }
 0x4fb   : > { %4342 = vmatpush1.bf16.msra.mxu0 %v6603_v48  ;;  %4386 = vmatpush1.bf16.msra.mxu1 %v6581_v36 }
 0x4fc   : > { %4388 = vmatprep.subr.bf16.mxu1 %v6649_v61  ;;  %4150 = vmatprep.mubr.f32.mxu1 %v6979_v47 }
 0x4fe   : > { %3609 = vmatmul.mubr.f32.vlgmr.msra.gmra.mrb[8].mxu0 %v6519_v44 }
 0x4ff   : > { %4390 = vmatpush1.bf16.msra.mxu1 %v6642_v29 }
 0x502   : > { %4152 = vmatmul.mubr.f32.vlgmr.msra.gmra.mrb[8].mxu1 %v6519_v44 }
 0x5d1   : > { %v3610_v34 = vpop.f32.mrb[8].mxu0 }
 0x5d2   : > { %v4407_v11 = vadd.f32 %v3610_v34, %v3066_v27  ;;  %v3612_v21 = vpop.f32.mrb[9].mxu0 }
 0x5d3   : > { %v4408_v9 = vadd.f32 %v3612_v21, %v3066_v27 }
 0x5d4   : > { %v4158_v54 = vadd.f32 %v4759_v57, %v4407_v11 }
 0x5d5   : > { %v4159_v36 = vadd.f32 %v4760_v42, %v4408_v9  ;;  %v4153_v52 = vpop.f32.mrb[8].mxu1 }
 0x5d6   : > { %4162 = vst [vmem:[%s434_s23] sm:$0xff] %v4158_v54  ;;  %v4409_v1 = vadd.f32 %v4153_v52, %v3066_v27  ;;  %v4155_v41 = vpop.f32.mrb[9].mxu1 }
 0x5d7   : > { %4163 = vst [vmem:[%s434_s23 + $0x8] sm:$0xff] %v4159_v36  ;;  %v4410_v44 = vadd.f32 %v4155_v41, %v3066_v27 }
 0x5d8   : > { %v4160_v14 = vadd.f32 %v4761_v6, %v4409_v1 }
 0x5d9   : > { %v4161_v18 = vadd.f32 %v4762_v38, %v4410_v44 }
 0x5da   : > { %4164 = vst [vmem:[%s434_s23 + $0x10] sm:$0xff] %v4160_v14 }
 0x5db   : > { %4165 = vst [vmem:[%s434_s23 + $0x18] sm:$0xff] %v4161_v18 }
 0x5dc   : > { %4776 = shalt.err (!%p4773_p3)
}
 0x5dd   : > { %s4777_s22 = scalar_lea.hbm %s6771_s21, 512  ;;  %s4781_s15 = scalar_lea.hbm %s6826_s13, 1024 }
 0x5de   : > { %p4778_p4 = scmp.ne.s32.totalorder %s6771_s21, %s4777_s22  ;;  %p4782_p9 = scmp.lt.u32.totalorder %s6771_s21, %s6826_s13 }
 0x5df   : > { %p4783_p10 = scmp.lt.u32.totalorder %s4781_s15, %s4777_s22  ;;  %p4785_p12 = scmp.lt.u32.totalorder %s4777_s22, %s6771_s21 }
 0x5e0   : > { %p4779_p7 = pnand %p4778_p4, %p4950_p5 }
 0x5e1   : > { %p4784_p11 = por %p4783_p10, %p4782_p9 }
 0x5e2   : > { %p4780_p8 = pneg %p4779_p7 }
 0x5e3   : > { %p4786_p13 = por %p4785_p12, %p4784_p11 }
 0x5e5   : > { %p4787_p0 = pnand %p4786_p13, %p4780_p8 }
 0x5e7   : > { %4790 = shalt.err (!%p4787_p0)
}
 0x5e8   : > { %4511 = dma.vmem_to_hbm [thread:$0]  (%p4950_p5), %s6773_s30, 512, %s6771_s21, %s4167_s29  }
 0x5e9 PF: > { %p4517_p1 = scmp.ge.s32.totalorder %s4825_s28, 2  ;;  %s4193_s1 = sand.u32 1, %s4813_s25  }
 0x5ea   : > { %s4194_s16 = scalar_lea.sflag [#allocation3], %s4193_s1 }
 0x5eb   : > { %p4514_p2 = pnand %p4517_p1, %p4954_p6 }
 0x5ed   : > { %4808 = dma.done.wait (!%p4514_p2), %s4194_s16, 512  }
 0x5ee   : > { %4810 = vsyncadd (!%p4514_p2), %s4194_s16, 4294966784  ;;  %p23_p3 = scmp.ge.s32.totalorder %s4937_s14, 4   ;;  %s6983_s25 = smov %s4817_s26 }
 0x5ef   : > { %s6984_s26 = smov %s4821_s27  ;;  %s6985_s27 = smov %s4948_s17 }
 0x5f0   : > { %s6986_s28 = smov %s4937_s14  ;;  %25 = sbr.rel (!%p23_p3) target bundleno = 7 (0x7), region = 107 }
 0x5f7   :  { %4199 = vsyncpa [#allocation3], 1 }
 0x5f8   :  { %4201 = vsyncpa [#allocation3 + $0x1], 1 }

</bundles_post_ra>
